<compile_context>
chip_gen: v6e
topology: v6e:2x2x1
jax: 0.10.0
libtpu: 0.0.40
codegen_flags: <defaults>
</compile_context>

<pallas_src>
import functools

import jax
import jax.numpy as jnp
from jax.experimental import pallas as pl
from jax.experimental.pallas import tpu as pltpu

# Matmul-operand dtype (MXU inputs).  Accumulation and all elementwise epilogue
# math stay f32 (important on v5e, which has no native bf16 VPU path).
MXU_DTYPE = jnp.bfloat16


# ----------------------------- Pallas kernels -----------------------------

def _linear_kernel(x_ref, w_ref, b_ref, o_ref, *, relu):
    y = jnp.dot(x_ref[...], w_ref[...], preferred_element_type=jnp.float32)
    y = y + b_ref[...]
    if relu:
        y = jnp.maximum(y, 0.0)
    o_ref[...] = y.astype(o_ref.dtype)


def _linear_add_kernel(x_ref, w_ref, b_ref, add_ref, o_ref, *, relu):
    # fused: (x @ W + b) + spectral_branch, then optional ReLU (all epilogue f32)
    y = jnp.dot(x_ref[...], w_ref[...], preferred_element_type=jnp.float32)
    y = y + b_ref[...] + add_ref[...]
    if relu:
        y = jnp.maximum(y, 0.0)
    o_ref[...] = y.astype(o_ref.dtype)


def _mlp2_kernel(x_ref, w1_ref, b1_ref, w2_ref, b2_ref, o_ref):
    # fused fc1 (ReLU) + fc2; (tm, 128) intermediate never leaves VMEM.
    h = jnp.dot(x_ref[...], w1_ref[...], preferred_element_type=jnp.float32)
    h = jnp.maximum(h + b1_ref[...], 0.0)
    y = jnp.dot(h.astype(w2_ref.dtype), w2_ref[...],
                preferred_element_type=jnp.float32)
    o_ref[...] = (y + b2_ref[...]).astype(o_ref.dtype)


def _spectral_mix_kernel(a_ref, w_ref, o_ref):
    # batched per-mode channel mixing:
    #   a: (PBLK, R, Cin), w: (PBLK, Cin, Cout) -> (PBLK, R, Cout)
    o_ref[...] = jnp.einsum(
        "pri,pio->pro", a_ref[...], w_ref[...],
        preferred_element_type=jnp.float32,
    ).astype(o_ref.dtype)


# ------------------------------ wrappers -----------------------------------

def _pick_tm(M, cap=2048):
    """Row-tile size: largest multiple-of-8 divisor of M giving >=2 grid steps,
    capped so per-block VMEM stays far below v7x's 64 MiB even at large M."""
    if M % 8 != 0 or M <= 16:
        return M
    limit = min(M // 2, cap)
    best = None
    for t in range(8, limit + 1, 8):
        if M % t == 0:
            best = t
    return best if best is not None else M


def linear(x, w, b, *, add=None, relu=False):
    """y = relu?( x @ w + b (+ add) ); x: (M,K), w: (K,N), b: (N,), add: (M,N)."""
    M, K = x.shape
    N = w.shape[1]
    tm = _pick_tm(M)
    grid = (M // tm,)

    xc = x.astype(MXU_DTYPE)
    wc = w.astype(MXU_DTYPE)
    b2 = b.reshape(1, N).astype(jnp.float32)

    x_spec = pl.BlockSpec((tm, K), lambda i: (i, 0))
    w_spec = pl.BlockSpec((K, N), lambda i: (0, 0))
    b_spec = pl.BlockSpec((1, N), lambda i: (0, 0))
    o_spec = pl.BlockSpec((tm, N), lambda i: (i, 0))
    out_shape = jax.ShapeDtypeStruct((M, N), jnp.float32)
    cp = pltpu.CompilerParams(dimension_semantics=("parallel",))

    if add is None:
        return pl.pallas_call(
            functools.partial(_linear_kernel, relu=relu),
            out_shape=out_shape,
            grid=grid,
            in_specs=[x_spec, w_spec, b_spec],
            out_specs=o_spec,
            compiler_params=cp,
        )(xc, wc, b2)

    add_spec = pl.BlockSpec((tm, N), lambda i: (i, 0))
    return pl.pallas_call(
        functools.partial(_linear_add_kernel, relu=relu),
        out_shape=out_shape,
        grid=grid,
        in_specs=[x_spec, w_spec, b_spec, add_spec],
        out_specs=o_spec,
        compiler_params=cp,
    )(xc, wc, b2, add.astype(jnp.float32))


def mlp_head(x, w1, b1, w2, b2):
    """Fused projection: relu(x@w1+b1)@w2+b2.
    fc2 output is written into a lane-dense 128-wide padded slab and sliced."""
    M, K = x.shape
    Hd = w1.shape[1]          # 128
    N = w2.shape[1]           # num_heads
    NP = max(128, ((N + 127) // 128) * 128)

    w2p = jnp.zeros((Hd, NP), jnp.float32).at[:, :N].set(w2)
    b2p = jnp.zeros((NP,), jnp.float32).at[:N].set(b2)

    tm = _pick_tm(M)
    grid = (M // tm,)

    out = pl.pallas_call(
        _mlp2_kernel,
        out_shape=jax.ShapeDtypeStruct((M, NP), jnp.float32),
        grid=grid,
        in_specs=[
            pl.BlockSpec((tm, K), lambda i: (i, 0)),
            pl.BlockSpec((K, Hd), lambda i: (0, 0)),
            pl.BlockSpec((1, Hd), lambda i: (0, 0)),
            pl.BlockSpec((Hd, NP), lambda i: (0, 0)),
            pl.BlockSpec((1, NP), lambda i: (0, 0)),
        ],
        out_specs=pl.BlockSpec((tm, NP), lambda i: (i, 0)),
        compiler_params=pltpu.CompilerParams(dimension_semantics=("parallel",)),
    )(x.astype(MXU_DTYPE), w1.astype(MXU_DTYPE),
      b1.reshape(1, Hd).astype(jnp.float32),
      w2p.astype(MXU_DTYPE), b2p.reshape(1, NP))
    return out[:, :N]


def spectral_mix(a, w):
    """Per-mode channel mixing, batched over modes.
    a: (P, R, Cin), w: (P, Cin, Cout) -> (P, R, Cout), f32 output.
    Grid splits P into 2 halves so both v7x TensorCores get work."""
    P, R, Cin = a.shape
    Cout = w.shape[2]
    n_blocks = 2 if P % 2 == 0 else 1
    pblk = P // n_blocks
    return pl.pallas_call(
        _spectral_mix_kernel,
        out_shape=jax.ShapeDtypeStruct((P, R, Cout), jnp.float32),
        grid=(n_blocks,),
        in_specs=[
            pl.BlockSpec((pblk, R, Cin), lambda g: (g, 0, 0)),
            pl.BlockSpec((pblk, Cin, Cout), lambda g: (g, 0, 0)),
        ],
        out_specs=pl.BlockSpec((pblk, R, Cout), lambda g: (g, 0, 0)),
        compiler_params=pltpu.CompilerParams(dimension_semantics=("parallel",)),
    )(a.astype(MXU_DTYPE), w.astype(MXU_DTYPE))


def spectral_conv2d_amplitude(x_nhwc, w_packed, m1, m2):
    """SpectralConv2dAmplitude: rfft2 -> real-weight mixing on low modes -> irfft2.

    x_nhwc: (B, H, W, Cin) real.
    w_packed: (2*m1*m2, Cin, Cout) real — low (positive) modes first, then high
              (negative-frequency) modes; packed once at init.
    Returns (B, H, W, Cout) real.
    """
    B, H, W, Cin = x_nhwc.shape
    Cout = w_packed.shape[2]
    Wf = W // 2 + 1
    if H < 2 * m1 or Wf < m2:
        raise ValueError("modes exceed available Fourier modes (would overlap)")

    x_ft = jnp.fft.rfft2(x_nhwc, axes=(1, 2))  # (B, H, Wf, Cin) complex64

    low = x_ft[:, :m1, :m2, :]          # (B, m1, m2, Cin)
    high = x_ft[:, H - m1:, :m2, :]     # (B, m1, m2, Cin)

    # pad real+imag row stack to a full 8-sublane group
    R = max(8, ((2 * B + 7) // 8) * 8)

    def pack(block):
        # (B, m1, m2, Cin) complex -> (m1*m2, R, Cin) real
        # rows = [re(b=0..B-1), im(b=0..B-1), zero pad]
        stacked = jnp.concatenate([jnp.real(block), jnp.imag(block)], axis=0)
        stacked = jnp.transpose(stacked, (1, 2, 0, 3)).reshape(m1 * m2, 2 * B, Cin)
        pad = R - 2 * B
        if pad:
            stacked = jnp.pad(stacked, ((0, 0), (0, pad), (0, 0)))
        return stacked

    a = jnp.concatenate([pack(low), pack(high)], axis=0)   # (2*m1*m2, R, Cin)

    out = spectral_mix(a, w_packed)                        # (2*m1*m2, R, Cout)

    def unpack(o):
        o = o[:, : 2 * B, :].reshape(m1, m2, 2 * B, Cout).transpose(2, 0, 1, 3)
        return o[:B] + 1j * o[B:]

    half = m1 * m2
    out_low = unpack(out[:half])
    out_high = unpack(out[half:])

    out_ft = jnp.zeros((B, H, Wf, Cout), dtype=jnp.complex64)
    out_ft = out_ft.at[:, :m1, :m2, :].set(out_low)
    out_ft = out_ft.at[:, H - m1:, :m2, :].set(out_high)

    return jnp.fft.irfft2(out_ft, s=(H, W), axes=(1, 2)).astype(jnp.float32)


# ------------------------------ full forward --------------------------------

def fno_block2d_amplitude_forward(x, params, *, modes1, modes2):
    """x: (B, C_in, H, W) NCHW -> (B, num_heads, H, W) NCHW."""
    B, Cin, H, W = x.shape
    width = params["fc0_w"].shape[1]
    num_heads = params["fc2_w"].shape[1]

    # lift: permute to NHWC, per-pixel linear
    h = jnp.transpose(x, (0, 2, 3, 1)).reshape(B * H * W, Cin)
    h = linear(h, params["fc0_w"], params["fc0_b"])
    h = h.reshape(B, H, W, width)

    # 4 Fourier layers: x = relu( conv_l(x) + w_l(x) )  (no relu on last)
    for l in range(4):
        x1 = spectral_conv2d_amplitude(h, params[f"conv{l}_wp"], modes1, modes2)
        h_flat = h.reshape(B * H * W, width)
        x1_flat = x1.reshape(B * H * W, width)
        h_flat = linear(
            h_flat, params[f"w{l}_w"], params[f"w{l}_b"],
            add=x1_flat, relu=(l < 3),
        )
        h = h_flat.reshape(B, H, W, width)

    # project (fused fc1 + fc2)
    h = h.reshape(B * H * W, width)
    h = mlp_head(h, params["fc1_w"], params["fc1_b"],
                 params["fc2_w"], params["fc2_b"])
    out = h.reshape(B, H, W, num_heads)
    return jnp.transpose(out, (0, 3, 1, 2))


# ------------------------------ params ---------------------------------------

def _pack_spectral_weight(w1, w2):
    """(Cin, Cout, m1, m2) x2 -> (2*m1*m2, Cin, Cout), low modes then high."""
    def wpack(w):
        Cin, Cout, m1, m2 = w.shape
        return jnp.transpose(w, (2, 3, 0, 1)).reshape(m1 * m2, Cin, Cout)
    return jnp.concatenate([wpack(w1), wpack(w2)], axis=0)


def init_params(key, in_ch, width, modes1, modes2, num_heads):
    ks = iter(jax.random.split(key, 64))
    p = {}
    p["fc0_w"] = jax.random.normal(next(ks), (in_ch, width), jnp.float32) * 0.1
    p["fc0_b"] = jax.random.normal(next(ks), (width,), jnp.float32) * 0.01
    scale = 1.0 / (width * width)
    for l in range(4):
        w1 = scale * jax.random.uniform(
            next(ks), (width, width, modes1, modes2), jnp.float32)
        w2 = scale * jax.random.uniform(
            next(ks), (width, width, modes1, modes2), jnp.float32)
        # hoisted weight repack (layer constant) — done once, not per forward
        p[f"conv{l}_wp"] = _pack_spectral_weight(w1, w2)
        p[f"w{l}_w"] = jax.random.normal(next(ks), (width, width), jnp.float32) * 0.1
        p[f"w{l}_b"] = jax.random.normal(next(ks), (width,), jnp.float32) * 0.01
    p["fc1_w"] = jax.random.normal(next(ks), (width, 128), jnp.float32) * 0.1
    p["fc1_b"] = jax.random.normal(next(ks), (128,), jnp.float32) * 0.01
    p["fc2_w"] = jax.random.normal(next(ks), (128, num_heads), jnp.float32) * 0.1
    p["fc2_b"] = jax.random.normal(next(ks), (num_heads,), jnp.float32) * 0.01
    return p


# ------------------------------ main ------------------------------------------

if __name__ == "__main__":
    modes1, modes2 = 6, 6
    width = 32
    num_heads = 4
    in_ch = 4            # config['experiment']['inputHeads']
    B, H, W = 2, 16, 16

    key = jax.random.PRNGKey(0)
    kx, kp = jax.random.split(key)
    x = jax.random.normal(kx, (B, in_ch, H, W), dtype=jnp.float32)
    params = init_params(kp, in_ch, width, modes1, modes2, num_heads)

    fwd = jax.jit(functools.partial(
        fno_block2d_amplitude_forward, modes1=modes1, modes2=modes2))
    out = fwd(x, params)
    jax.block_until_ready(out)
    assert out.shape == (B, num_heads, H, W), out.shape
    assert jnp.all(jnp.isfinite(out))
    print("KERNEL_OK")
</pallas_src>

<mosaic_0001>
module attributes {stable_mosaic.version = 11 : i64} {
  func.func @_linear_kernel(%arg0: i32, %arg1: memref<256x4xbf16, #tpu.memory_space<vmem>>, %arg2: memref<4x32xbf16, #tpu.memory_space<vmem>>, %arg3: memref<1x32xf32, #tpu.memory_space<vmem>>, %arg4: memref<256x32xf32, #tpu.memory_space<vmem>>) attributes {dimension_semantics = [#tpu.dimension_semantics<parallel>], iteration_bounds = array<i64: 2>, scalar_prefetch = 0 : i64, scratch_operands = 0 : i64, tpu.core_type = #tpu.core_type<tc>, window_params = [{transform_indices = @transform_0, window_bounds = array<i64: 256, 4>}, {pipeline_mode = #tpu.pipeline_mode<synchronous>, transform_indices = @transform_1, window_bounds = array<i64: 4, 32>}, {pipeline_mode = #tpu.pipeline_mode<synchronous>, transform_indices = @transform_2, window_bounds = array<i64: 1, 32>}, {transform_indices = @transform_3, window_bounds = array<i64: 256, 32>}]} {
    %c0 = arith.constant 0 : index
    %c0_0 = arith.constant 0 : index
    %0 = vector.load %arg1[%c0, %c0_0] : memref<256x4xbf16, #tpu.memory_space<vmem>>, vector<256x4xbf16>
    %c0_1 = arith.constant 0 : index
    %c0_2 = arith.constant 0 : index
    %1 = vector.load %arg2[%c0_1, %c0_2] : memref<4x32xbf16, #tpu.memory_space<vmem>>, vector<4x32xbf16>
    %cst = arith.constant dense<0.000000e+00> : vector<256x32xf32>
    %2 = tpu.matmul %0, %1, %cst {dimension_numbers = #tpu.dot_dimension_numbers<[1], [0], [0], [1], [0, 0, 1, 1], [], []>} : vector<256x4xbf16>, vector<4x32xbf16>, vector<256x32xf32> -> vector<256x32xf32>
    %c0_3 = arith.constant 0 : index
    %c0_4 = arith.constant 0 : index
    %3 = vector.load %arg3[%c0_3, %c0_4] : memref<1x32xf32, #tpu.memory_space<vmem>>, vector<1x32xf32>
    %4 = vector.broadcast %3 : vector<1x32xf32> to vector<256x32xf32>
    %5 = arith.addf %2, %4 : vector<256x32xf32>
    %c0_5 = arith.constant 0 : index
    %c0_6 = arith.constant 0 : index
    %6 = vector.load %arg4[%c0_5, %c0_6] : memref<256x32xf32, #tpu.memory_space<vmem>>, vector<256x32xf32>
    tpu.vector_store %arg4[%c0_5, %c0_6], %5 {strides = array<i32>} : memref<256x32xf32, #tpu.memory_space<vmem>>, vector<256x32xf32>,
    return
  }
  func.func @transform_0(%arg0: i32) -> (i32, i32) {
    %c0_i32 = arith.constant 0 : i32
    %c0_i32_0 = arith.constant 0 : i32
    return %arg0, %c0_i32 : i32, i32
  }
  func.func @transform_1(%arg0: i32) -> (i32, i32) {
    %c0_i32 = arith.constant 0 : i32
    %c0_i32_0 = arith.constant 0 : i32
    %c0_i32_1 = arith.constant 0 : i32
    return %c0_i32, %c0_i32_0 : i32, i32
  }
  func.func @transform_2(%arg0: i32) -> (i32, i32) {
    %c0_i32 = arith.constant 0 : i32
    %c0_i32_0 = arith.constant 0 : i32
    %c0_i32_1 = arith.constant 0 : i32
    return %c0_i32, %c0_i32_0 : i32, i32
  }
  func.func @transform_3(%arg0: i32) -> (i32, i32) {
    %c0_i32 = arith.constant 0 : i32
    %c0_i32_0 = arith.constant 0 : i32
    return %arg0, %c0_i32 : i32, i32
  }
}

module attributes {stable_mosaic.version = 11 : i64} {
  func.func @_spectral_mix_kernel(%arg0: i32, %arg1: memref<36x8x32xbf16, #tpu.memory_space<vmem>>, %arg2: memref<36x32x32xbf16, #tpu.memory_space<vmem>>, %arg3: memref<36x8x32xf32, #tpu.memory_space<vmem>>) attributes {dimension_semantics = [#tpu.dimension_semantics<parallel>], iteration_bounds = array<i64: 2>, scalar_prefetch = 0 : i64, scratch_operands = 0 : i64, tpu.core_type = #tpu.core_type<tc>, window_params = [{transform_indices = @transform_0, window_bounds = array<i64: 36, 8, 32>}, {transform_indices = @transform_1, window_bounds = array<i64: 36, 32, 32>}, {transform_indices = @transform_2, window_bounds = array<i64: 36, 8, 32>}]} {
    %c0 = arith.constant 0 : index
    %c0_0 = arith.constant 0 : index
    %c0_1 = arith.constant 0 : index
    %0 = vector.load %arg1[%c0, %c0_0, %c0_1] : memref<36x8x32xbf16, #tpu.memory_space<vmem>>, vector<36x8x32xbf16>
    %c0_2 = arith.constant 0 : index
    %c0_3 = arith.constant 0 : index
    %c0_4 = arith.constant 0 : index
    %1 = vector.load %arg2[%c0_2, %c0_3, %c0_4] : memref<36x32x32xbf16, #tpu.memory_space<vmem>>, vector<36x32x32xbf16>
    "tpu.trace_start"() <{level = 10 : i32, message = "pri,pio->pro"}> : () -> ()
    %cst = arith.constant dense<0.000000e+00> : vector<36x8x32xf32>
    %2 = tpu.matmul %0, %1, %cst {dimension_numbers = #tpu.dot_dimension_numbers<[2], [1], [1], [2], [0, 0, 0, 1, 1, 2], [0], [0]>} : vector<36x8x32xbf16>, vector<36x32x32xbf16>, vector<36x8x32xf32> -> vector<36x8x32xf32>
    "tpu.trace_stop"() : () -> ()
    %c0_5 = arith.constant 0 : index
    %c0_6 = arith.constant 0 : index
    %c0_7 = arith.constant 0 : index
    %3 = vector.load %arg3[%c0_5, %c0_6, %c0_7] : memref<36x8x32xf32, #tpu.memory_space<vmem>>, vector<36x8x32xf32>
    tpu.vector_store %arg3[%c0_5, %c0_6, %c0_7], %2 {strides = array<i32>} : memref<36x8x32xf32, #tpu.memory_space<vmem>>, vector<36x8x32xf32>,
    return
  }
  func.func @transform_0(%arg0: i32) -> (i32, i32, i32) {
    %c0_i32 = arith.constant 0 : i32
    %c0_i32_0 = arith.constant 0 : i32
    %c0_i32_1 = arith.constant 0 : i32
    return %arg0, %c0_i32, %c0_i32_0 : i32, i32, i32
  }
  func.func @transform_1(%arg0: i32) -> (i32, i32, i32) {
    %c0_i32 = arith.constant 0 : i32
    %c0_i32_0 = arith.constant 0 : i32
    %c0_i32_1 = arith.constant 0 : i32
    return %arg0, %c0_i32, %c0_i32_0 : i32, i32, i32
  }
  func.func @transform_2(%arg0: i32) -> (i32, i32, i32) {
    %c0_i32 = arith.constant 0 : i32
    %c0_i32_0 = arith.constant 0 : i32
    %c0_i32_1 = arith.constant 0 : i32
    return %arg0, %c0_i32, %c0_i32_0 : i32, i32, i32
  }
}

module attributes {stable_mosaic.version = 11 : i64} {
  func.func @_linear_add_kernel(%arg0: i32, %arg1: memref<256x32xbf16, #tpu.memory_space<vmem>>, %arg2: memref<32x32xbf16, #tpu.memory_space<vmem>>, %arg3: memref<1x32xf32, #tpu.memory_space<vmem>>, %arg4: memref<256x32xf32, #tpu.memory_space<vmem>>, %arg5: memref<256x32xf32, #tpu.memory_space<vmem>>) attributes {dimension_semantics = [#tpu.dimension_semantics<parallel>], iteration_bounds = array<i64: 2>, scalar_prefetch = 0 : i64, scratch_operands = 0 : i64, tpu.core_type = #tpu.core_type<tc>, window_params = [{transform_indices = @transform_0, window_bounds = array<i64: 256, 32>}, {pipeline_mode = #tpu.pipeline_mode<synchronous>, transform_indices = @transform_1, window_bounds = array<i64: 32, 32>}, {pipeline_mode = #tpu.pipeline_mode<synchronous>, transform_indices = @transform_2, window_bounds = array<i64: 1, 32>}, {transform_indices = @transform_3, window_bounds = array<i64: 256, 32>}, {transform_indices = @transform_4, window_bounds = array<i64: 256, 32>}]} {
    %c0 = arith.constant 0 : index
    %c0_0 = arith.constant 0 : index
    %0 = vector.load %arg1[%c0, %c0_0] : memref<256x32xbf16, #tpu.memory_space<vmem>>, vector<256x32xbf16>
    %c0_1 = arith.constant 0 : index
    %c0_2 = arith.constant 0 : index
    %1 = vector.load %arg2[%c0_1, %c0_2] : memref<32x32xbf16, #tpu.memory_space<vmem>>, vector<32x32xbf16>
    %cst = arith.constant dense<0.000000e+00> : vector<256x32xf32>
    %2 = tpu.matmul %0, %1, %cst {dimension_numbers = #tpu.dot_dimension_numbers<[1], [0], [0], [1], [0, 0, 1, 1], [], []>} : vector<256x32xbf16>, vector<32x32xbf16>, vector<256x32xf32> -> vector<256x32xf32>
    %c0_3 = arith.constant 0 : index
    %c0_4 = arith.constant 0 : index
    %3 = vector.load %arg3[%c0_3, %c0_4] : memref<1x32xf32, #tpu.memory_space<vmem>>, vector<1x32xf32>
    %4 = vector.broadcast %3 : vector<1x32xf32> to vector<256x32xf32>
    %5 = arith.addf %2, %4 : vector<256x32xf32>
    %c0_5 = arith.constant 0 : index
    %c0_6 = arith.constant 0 : index
    %6 = vector.load %arg4[%c0_5, %c0_6] : memref<256x32xf32, #tpu.memory_space<vmem>>, vector<256x32xf32>
    %7 = arith.addf %5, %6 : vector<256x32xf32>
    %cst_7 = arith.constant 0.000000e+00 : f32
    %8 = vector.broadcast %cst_7 : f32 to vector<256x32xf32>
    %9 = arith.maximumf %7, %8 : vector<256x32xf32>
    %c0_8 = arith.constant 0 : index
    %c0_9 = arith.constant 0 : index
    %10 = vector.load %arg5[%c0_8, %c0_9] : memref<256x32xf32, #tpu.memory_space<vmem>>, vector<256x32xf32>
    tpu.vector_store %arg5[%c0_8, %c0_9], %9 {strides = array<i32>} : memref<256x32xf32, #tpu.memory_space<vmem>>, vector<256x32xf32>,
    return
  }
  func.func @transform_0(%arg0: i32) -> (i32, i32) {
    %c0_i32 = arith.constant 0 : i32
    %c0_i32_0 = arith.constant 0 : i32
    return %arg0, %c0_i32 : i32, i32
  }
  func.func @transform_1(%arg0: i32) -> (i32, i32) {
    %c0_i32 = arith.constant 0 : i32
    %c0_i32_0 = arith.constant 0 : i32
    %c0_i32_1 = arith.constant 0 : i32
    return %c0_i32, %c0_i32_0 : i32, i32
  }
  func.func @transform_2(%arg0: i32) -> (i32, i32) {
    %c0_i32 = arith.constant 0 : i32
    %c0_i32_0 = arith.constant 0 : i32
    %c0_i32_1 = arith.constant 0 : i32
    return %c0_i32, %c0_i32_0 : i32, i32
  }
  func.func @transform_3(%arg0: i32) -> (i32, i32) {
    %c0_i32 = arith.constant 0 : i32
    %c0_i32_0 = arith.constant 0 : i32
    return %arg0, %c0_i32 : i32, i32
  }
  func.func @transform_4(%arg0: i32) -> (i32, i32) {
    %c0_i32 = arith.constant 0 : i32
    %c0_i32_0 = arith.constant 0 : i32
    return %arg0, %c0_i32 : i32, i32
  }
}

module attributes {stable_mosaic.version = 11 : i64} {
  func.func @_linear_add_kernel(%arg0: i32, %arg1: memref<256x32xbf16, #tpu.memory_space<vmem>>, %arg2: memref<32x32xbf16, #tpu.memory_space<vmem>>, %arg3: memref<1x32xf32, #tpu.memory_space<vmem>>, %arg4: memref<256x32xf32, #tpu.memory_space<vmem>>, %arg5: memref<256x32xf32, #tpu.memory_space<vmem>>) attributes {dimension_semantics = [#tpu.dimension_semantics<parallel>], iteration_bounds = array<i64: 2>, scalar_prefetch = 0 : i64, scratch_operands = 0 : i64, tpu.core_type = #tpu.core_type<tc>, window_params = [{transform_indices = @transform_0, window_bounds = array<i64: 256, 32>}, {pipeline_mode = #tpu.pipeline_mode<synchronous>, transform_indices = @transform_1, window_bounds = array<i64: 32, 32>}, {pipeline_mode = #tpu.pipeline_mode<synchronous>, transform_indices = @transform_2, window_bounds = array<i64: 1, 32>}, {transform_indices = @transform_3, window_bounds = array<i64: 256, 32>}, {transform_indices = @transform_4, window_bounds = array<i64: 256, 32>}]} {
    %c0 = arith.constant 0 : index
    %c0_0 = arith.constant 0 : index
    %0 = vector.load %arg1[%c0, %c0_0] : memref<256x32xbf16, #tpu.memory_space<vmem>>, vector<256x32xbf16>
    %c0_1 = arith.constant 0 : index
    %c0_2 = arith.constant 0 : index
    %1 = vector.load %arg2[%c0_1, %c0_2] : memref<32x32xbf16, #tpu.memory_space<vmem>>, vector<32x32xbf16>
    %cst = arith.constant dense<0.000000e+00> : vector<256x32xf32>
    %2 = tpu.matmul %0, %1, %cst {dimension_numbers = #tpu.dot_dimension_numbers<[1], [0], [0], [1], [0, 0, 1, 1], [], []>} : vector<256x32xbf16>, vector<32x32xbf16>, vector<256x32xf32> -> vector<256x32xf32>
    %c0_3 = arith.constant 0 : index
    %c0_4 = arith.constant 0 : index
    %3 = vector.load %arg3[%c0_3, %c0_4] : memref<1x32xf32, #tpu.memory_space<vmem>>, vector<1x32xf32>
    %4 = vector.broadcast %3 : vector<1x32xf32> to vector<256x32xf32>
    %5 = arith.addf %2, %4 : vector<256x32xf32>
    %c0_5 = arith.constant 0 : index
    %c0_6 = arith.constant 0 : index
    %6 = vector.load %arg4[%c0_5, %c0_6] : memref<256x32xf32, #tpu.memory_space<vmem>>, vector<256x32xf32>
    %7 = arith.addf %5, %6 : vector<256x32xf32>
    %c0_7 = arith.constant 0 : index
    %c0_8 = arith.constant 0 : index
    %8 = vector.load %arg5[%c0_7, %c0_8] : memref<256x32xf32, #tpu.memory_space<vmem>>, vector<256x32xf32>
    tpu.vector_store %arg5[%c0_7, %c0_8], %7 {strides = array<i32>} : memref<256x32xf32, #tpu.memory_space<vmem>>, vector<256x32xf32>,
    return
  }
  func.func @transform_0(%arg0: i32) -> (i32, i32) {
    %c0_i32 = arith.constant 0 : i32
    %c0_i32_0 = arith.constant 0 : i32
    return %arg0, %c0_i32 : i32, i32
  }
  func.func @transform_1(%arg0: i32) -> (i32, i32) {
    %c0_i32 = arith.constant 0 : i32
    %c0_i32_0 = arith.constant 0 : i32
    %c0_i32_1 = arith.constant 0 : i32
    return %c0_i32, %c0_i32_0 : i32, i32
  }
  func.func @transform_2(%arg0: i32) -> (i32, i32) {
    %c0_i32 = arith.constant 0 : i32
    %c0_i32_0 = arith.constant 0 : i32
    %c0_i32_1 = arith.constant 0 : i32
    return %c0_i32, %c0_i32_0 : i32, i32
  }
  func.func @transform_3(%arg0: i32) -> (i32, i32) {
    %c0_i32 = arith.constant 0 : i32
    %c0_i32_0 = arith.constant 0 : i32
    return %arg0, %c0_i32 : i32, i32
  }
  func.func @transform_4(%arg0: i32) -> (i32, i32) {
    %c0_i32 = arith.constant 0 : i32
    %c0_i32_0 = arith.constant 0 : i32
    return %arg0, %c0_i32 : i32, i32
  }
}

module attributes {stable_mosaic.version = 11 : i64} {
  func.func @_mlp2_kernel(%arg0: i32, %arg1: memref<256x32xbf16, #tpu.memory_space<vmem>>, %arg2: memref<32x128xbf16, #tpu.memory_space<vmem>>, %arg3: memref<1x128xf32, #tpu.memory_space<vmem>>, %arg4: memref<128x128xbf16, #tpu.memory_space<vmem>>, %arg5: memref<1x128xf32, #tpu.memory_space<vmem>>, %arg6: memref<256x128xf32, #tpu.memory_space<vmem>>) attributes {dimension_semantics = [#tpu.dimension_semantics<parallel>], iteration_bounds = array<i64: 2>, scalar_prefetch = 0 : i64, scratch_operands = 0 : i64, tpu.core_type = #tpu.core_type<tc>, window_params = [{transform_indices = @transform_0, window_bounds = array<i64: 256, 32>}, {pipeline_mode = #tpu.pipeline_mode<synchronous>, transform_indices = @transform_1, window_bounds = array<i64: 32, 128>}, {pipeline_mode = #tpu.pipeline_mode<synchronous>, transform_indices = @transform_2, window_bounds = array<i64: 1, 128>}, {pipeline_mode = #tpu.pipeline_mode<synchronous>, transform_indices = @transform_3, window_bounds = array<i64: 128, 128>}, {pipeline_mode = #tpu.pipeline_mode<synchronous>, transform_indices = @transform_4, window_bounds = array<i64: 1, 128>}, {transform_indices = @transform_5, window_bounds = array<i64: 256, 128>}]} {
    %c0 = arith.constant 0 : index
    %c0_0 = arith.constant 0 : index
    %0 = vector.load %arg1[%c0, %c0_0] : memref<256x32xbf16, #tpu.memory_space<vmem>>, vector<256x32xbf16>
    %c0_1 = arith.constant 0 : index
    %c0_2 = arith.constant 0 : index
    %1 = vector.load %arg2[%c0_1, %c0_2] : memref<32x128xbf16, #tpu.memory_space<vmem>>, vector<32x128xbf16>
    %cst = arith.constant dense<0.000000e+00> : vector<256x128xf32>
    %2 = tpu.matmul %0, %1, %cst {dimension_numbers = #tpu.dot_dimension_numbers<[1], [0], [0], [1], [0, 0, 1, 1], [], []>} : vector<256x32xbf16>, vector<32x128xbf16>, vector<256x128xf32> -> vector<256x128xf32>
    %c0_3 = arith.constant 0 : index
    %c0_4 = arith.constant 0 : index
    %3 = vector.load %arg3[%c0_3, %c0_4] : memref<1x128xf32, #tpu.memory_space<vmem>>, vector<1x128xf32>
    %4 = vector.broadcast %3 : vector<1x128xf32> to vector<256x128xf32>
    %5 = arith.addf %2, %4 : vector<256x128xf32>
    %cst_5 = arith.constant 0.000000e+00 : f32
    %6 = vector.broadcast %cst_5 : f32 to vector<256x128xf32>
    %7 = arith.maximumf %5, %6 : vector<256x128xf32>
    %8 = arith.truncf %7 : vector<256x128xf32> to vector<256x128xbf16>
    %c0_6 = arith.constant 0 : index
    %c0_7 = arith.constant 0 : index
    %9 = vector.load %arg4[%c0_6, %c0_7] : memref<128x128xbf16, #tpu.memory_space<vmem>>, vector<128x128xbf16>
    %cst_8 = arith.constant dense<0.000000e+00> : vector<256x128xf32>
    %10 = tpu.matmul %8, %9, %cst_8 {dimension_numbers = #tpu.dot_dimension_numbers<[1], [0], [0], [1], [0, 0, 1, 1], [], []>} : vector<256x128xbf16>, vector<128x128xbf16>, vector<256x128xf32> -> vector<256x128xf32>
    %c0_9 = arith.constant 0 : index
    %c0_10 = arith.constant 0 : index
    %11 = vector.load %arg5[%c0_9, %c0_10] : memref<1x128xf32, #tpu.memory_space<vmem>>, vector<1x128xf32>
    %12 = vector.broadcast %11 : vector<1x128xf32> to vector<256x128xf32>
    %13 = arith.addf %10, %12 : vector<256x128xf32>
    %c0_11 = arith.constant 0 : index
    %c0_12 = arith.constant 0 : index
    %14 = vector.load %arg6[%c0_11, %c0_12] : memref<256x128xf32, #tpu.memory_space<vmem>>, vector<256x128xf32>
    tpu.vector_store %arg6[%c0_11, %c0_12], %13 {strides = array<i32>} : memref<256x128xf32, #tpu.memory_space<vmem>>, vector<256x128xf32>,
    return
  }
  func.func @transform_0(%arg0: i32) -> (i32, i32) {
    %c0_i32 = arith.constant 0 : i32
    %c0_i32_0 = arith.constant 0 : i32
    return %arg0, %c0_i32 : i32, i32
  }
  func.func @transform_1(%arg0: i32) -> (i32, i32) {
    %c0_i32 = arith.constant 0 : i32
    %c0_i32_0 = arith.constant 0 : i32
    %c0_i32_1 = arith.constant 0 : i32
    return %c0_i32, %c0_i32_0 : i32, i32
  }
  func.func @transform_2(%arg0: i32) -> (i32, i32) {
    %c0_i32 = arith.constant 0 : i32
    %c0_i32_0 = arith.constant 0 : i32
    %c0_i32_1 = arith.constant 0 : i32
    return %c0_i32, %c0_i32_0 : i32, i32
  }
  func.func @transform_3(%arg0: i32) -> (i32, i32) {
    %c0_i32 = arith.constant 0 : i32
    %c0_i32_0 = arith.constant 0 : i32
    %c0_i32_1 = arith.constant 0 : i32
    return %c0_i32, %c0_i32_0 : i32, i32
  }
  func.func @transform_4(%arg0: i32) -> (i32, i32) {
    %c0_i32 = arith.constant 0 : i32
    %c0_i32_0 = arith.constant 0 : i32
    %c0_i32_1 = arith.constant 0 : i32
    return %c0_i32, %c0_i32_0 : i32, i32
  }
  func.func @transform_5(%arg0: i32) -> (i32, i32) {
    %c0_i32 = arith.constant 0 : i32
    %c0_i32_0 = arith.constant 0 : i32
    return %arg0, %c0_i32 : i32, i32
  }
}

</mosaic_0001>

<bundles_post_ra>
// kernel: fno_block2d_amplitude_forward.10
= control target key start
LH: loop header
LB: loop body
LE: loop exit
PB: predicated region body
PF: predicated region fallthrough
CT: control target
= control target key end

     0   :  { %s749_s12 = smov 0   ;;  %s910_s0 = inlined_call_operand.vmem [shape: bf16[512,4], index: 0, kind: input, shape index: {}]   ;;  %s911_s1 = inlined_call_operand.vmem [shape: bf16[4,32], index: 1, kind: input, shape index: {}]   ;;  %s912_s2 = inlined_call_operand.vmem [shape: f32[1,32], index: 2, kind: input, shape index: {}]   ;;  %s913_s3 = inlined_call_operand.vmem [shape: f32[512,32], index: 3, kind: output, shape index: {}]  }
   0x1 LB: > { %s598_s13 = sadd.s32 4294967295, %s727_s12   ;;  %p602_p0 = scmp.ge.s32.totalorder %s727_s12, 1  ;;  %s727_s12 = sphi %s749_s12, %s13_s12  }
   0x2   : > { %p138_p1 = scmp.lt.s32.totalorder %s727_s12, 3 }
   0x4   : > { %p139_p2 = pnand %p602_p0, %p138_p1 }
   0x5   : > { %s603_s16 = sshll.u32 (!%p139_p2), %s598_s13, 5 }
   0x6   : > { %142 = sbr.rel (%p139_p2) target bundleno = 243 (0xf3), region = 32  ;;  %p163_p3 = scmp.lt.s32.totalorder (!%p139_p2), %s603_s16, 63 }
   0xb   : > { %v207_v0 = vld [vmem:[%s911_s1] sm:$0x3]  ;;  %vm344_vm0 = vcmask 1041408   ;;  %s915_s16 = smov (!%p163_p3, %s603_s16), 63  ;;  %vm295_vm1 = vcmask 31744   ;;  %vm509_vm2 = vcmask 261120  }
   0xc   : > { %695 = vmatprep.subr.msk.bf16.mxu0 %vm344_vm0, %v207_v0  ;;  %696 = vmatprep.subr.msk.bf16.mxu1 %vm344_vm0, %v207_v0  ;;  %v346_v1 = vsel %vm344_vm0, %v207_v0, 0  ;;  %s604_s17 = sshll.u32 %s915_s16, 2  ;;  %s606_s21 = sshll.u32 %s915_s16, 3  ;;  %v804_v18 = vld [vmem:[%s912_s2] ss:$0 sm:$0xff] }
   0xd   : > { %660 = vmatpush3.bf16.msra.mxu0 %v346_v1  ;;  %694 = vmatpush3.bf16.msra.mxu1 %v346_v1  ;;  %s766_s20 = scalar_lea.vmem %s910_s0, %s604_s17  ;;  %s809_s26 = scalar_lea.vmem %s913_s3, %s606_s21 }
   0xe   : > { %v705_v2 = vld [vmem:[%s766_s20] sm:$0xff]   ;;  %v707_v4 = vld [vmem:[%s766_s20 + $0x8] sm:$0xff]   ;;  %v709_v6 = vld [vmem:[%s766_s20 + $0x10] sm:$0xff]  }
   0xf   : > { %v706_v3 = vld [vmem:[%s766_s20 + $0x40] sm:$0xff]   ;;  %661 = vmatprep.mubr.msk.bf16.mxu0 %vm295_vm1, %v705_v2  ;;  %v708_v5 = vld [vmem:[%s766_s20 + $0x48] sm:$0xff]   ;;  %v710_v7 = vld [vmem:[%s766_s20 + $0x50] sm:$0xff]  }
  0x10   : > { %677 = vmatprep.mubr.msk.bf16.mxu1 %vm295_vm1, %v706_v3  ;;  %662 = vmatmul.mubr.msk.bf16.vlgmr.msra.gmra.mxu0 %vm295_vm1, %v707_v4  ;;  %v711_v8 = vld [vmem:[%s766_s20 + $0x18] sm:$0xff]   ;;  %v713_v10 = vld [vmem:[%s766_s20 + $0x20] sm:$0xff]   ;;  %v715_v12 = vld [vmem:[%s766_s20 + $0x28] sm:$0xff]  }
  0x11   : > { %678 = vmatmul.mubr.msk.bf16.vlgmr.msra.gmra.mxu1 %vm295_vm1, %v708_v5  ;;  %665 = vmatprep.mubr.msk.bf16.mxu0 %vm295_vm1, %v709_v6  ;;  %v712_v9 = vld [vmem:[%s766_s20 + $0x58] sm:$0xff]   ;;  %v714_v11 = vld [vmem:[%s766_s20 + $0x60] sm:$0xff]   ;;  %v716_v13 = vld [vmem:[%s766_s20 + $0x68] sm:$0xff]  }
  0x12   : > { %681 = vmatprep.mubr.msk.bf16.mxu1 %vm295_vm1, %v710_v7  ;;  %v717_v14 = vld [vmem:[%s766_s20 + $0x30] sm:$0xff]   ;;  %v719_v16 = vld [vmem:[%s766_s20 + $0x38] sm:$0xff]  }
  0x13   : > { %v718_v15 = vld [vmem:[%s766_s20 + $0x70] sm:$0xff]   ;;  %v720_v17 = vld [vmem:[%s766_s20 + $0x78] sm:$0xff]  }
  0x18   : > { %666 = vmatmul.mubr.msk.bf16.gmra.mxu0 %vm295_vm1, %v711_v8 }
  0x19   : > { %682 = vmatmul.mubr.msk.bf16.gmra.mxu1 %vm295_vm1, %v712_v9  ;;  %669 = vmatprep.mubr.msk.bf16.mxu0 %vm295_vm1, %v713_v10 }
  0x1a   : > { %685 = vmatprep.mubr.msk.bf16.mxu1 %vm295_vm1, %v714_v11 }
  0x20   : > { %670 = vmatmul.mubr.msk.bf16.gmra.mxu0 %vm295_vm1, %v715_v12 }
  0x21   : > { %686 = vmatmul.mubr.msk.bf16.gmra.mxu1 %vm295_vm1, %v716_v13  ;;  %673 = vmatprep.mubr.msk.bf16.mxu0 %vm295_vm1, %v717_v14 }
  0x22   : > { %689 = vmatprep.mubr.msk.bf16.mxu1 %vm295_vm1, %v718_v15 }
  0x28   : > { %674 = vmatmul.mubr.msk.bf16.gmra.mxu0 %vm295_vm1, %v719_v16 }
  0x29   : > { %690 = vmatmul.mubr.msk.bf16.gmra.mxu1 %vm295_vm1, %v720_v17 }
  0xd0   : > { %v663_v19 = vpop.f32.mrf.mxu0 }
  0xd1   : > { %v391_v20 = vadd.f32 %v663_v19, %v804_v18  ;;  %v679_v21 = vpop.f32.mrf.mxu1 }
  0xd2   : > { %v455_v22 = vadd.f32 %v679_v21, %v804_v18  ;;  %v382_v23 = vpop.f32.mrf.mxu0 }
  0xd3   : > { %512 = vst.msk [vmem:[%s809_s26 + $0x10] sm:$0xff] %vm509_vm2, %v391_v20  ;;  %v383_v24 = vadd.f32 %v804_v18, %v382_v23  ;;  %v446_v25 = vpop.f32.mrf.mxu1 }
  0xd4   : > { %528 = vst.msk [vmem:[%s809_s26 + $0x90] sm:$0xff] %vm509_vm2, %v455_v22  ;;  %v447_v26 = vadd.f32 %v804_v18, %v446_v25  ;;  %v664_v27 = vpop.f32.mrf.mxu0 }
  0xd5   : > { %510 = vst.msk [vmem:[%s809_s26] sm:$0xff] %vm509_vm2, %v383_v24  ;;  %v394_v28 = vadd.f32 %v664_v27, %v804_v18  ;;  %v680_v29 = vpop.f32.mrf.mxu1 }
  0xd6   : > { %526 = vst.msk [vmem:[%s809_s26 + $0x80] sm:$0xff] %vm509_vm2, %v447_v26  ;;  %v458_v30 = vadd.f32 %v680_v29, %v804_v18  ;;  %v385_v31 = vpop.f32.mrf.mxu0 }
  0xd7   : > { %513 = vst.msk [vmem:[%s809_s26 + $0x18] sm:$0xff] %vm509_vm2, %v394_v28  ;;  %v386_v32 = vadd.f32 %v804_v18, %v385_v31  ;;  %v449_v33 = vpop.f32.mrf.mxu1 }
  0xd8   : > { %529 = vst.msk [vmem:[%s809_s26 + $0x98] sm:$0xff] %vm509_vm2, %v458_v30  ;;  %v450_v34 = vadd.f32 %v804_v18, %v449_v33  ;;  %v667_v35 = vpop.f32.mrf.mxu0 }
  0xd9   : > { %511 = vst.msk [vmem:[%s809_s26 + $0x8] sm:$0xff] %vm509_vm2, %v386_v32  ;;  %v407_v36 = vadd.f32 %v667_v35, %v804_v18  ;;  %v683_v37 = vpop.f32.mrf.mxu1 }
  0xda   : > { %527 = vst.msk [vmem:[%s809_s26 + $0x88] sm:$0xff] %vm509_vm2, %v450_v34  ;;  %v471_v38 = vadd.f32 %v683_v37, %v804_v18  ;;  %v398_v39 = vpop.f32.mrf.mxu0 }
  0xdb   : > { %516 = vst.msk [vmem:[%s809_s26 + $0x30] sm:$0xff] %vm509_vm2, %v407_v36  ;;  %v399_v40 = vadd.f32 %v804_v18, %v398_v39  ;;  %v462_v41 = vpop.f32.mrf.mxu1 }
  0xdc   : > { %532 = vst.msk [vmem:[%s809_s26 + $0xb0] sm:$0xff] %vm509_vm2, %v471_v38  ;;  %v463_v42 = vadd.f32 %v804_v18, %v462_v41  ;;  %v668_v43 = vpop.f32.mrf.mxu0 }
  0xdd   : > { %514 = vst.msk [vmem:[%s809_s26 + $0x20] sm:$0xff] %vm509_vm2, %v399_v40  ;;  %v410_v44 = vadd.f32 %v668_v43, %v804_v18  ;;  %v684_v45 = vpop.f32.mrf.mxu1 }
  0xde   : > { %530 = vst.msk [vmem:[%s809_s26 + $0xa0] sm:$0xff] %vm509_vm2, %v463_v42  ;;  %v474_v46 = vadd.f32 %v684_v45, %v804_v18  ;;  %v401_v47 = vpop.f32.mrf.mxu0 }
  0xdf   : > { %517 = vst.msk [vmem:[%s809_s26 + $0x38] sm:$0xff] %vm509_vm2, %v410_v44  ;;  %v402_v48 = vadd.f32 %v804_v18, %v401_v47  ;;  %v465_v49 = vpop.f32.mrf.mxu1 }
  0xe0   : > { %533 = vst.msk [vmem:[%s809_s26 + $0xb8] sm:$0xff] %vm509_vm2, %v474_v46  ;;  %v466_v50 = vadd.f32 %v804_v18, %v465_v49  ;;  %v671_v51 = vpop.f32.mrf.mxu0 }
  0xe1   : > { %515 = vst.msk [vmem:[%s809_s26 + $0x28] sm:$0xff] %vm509_vm2, %v402_v48  ;;  %v423_v52 = vadd.f32 %v671_v51, %v804_v18  ;;  %v687_v53 = vpop.f32.mrf.mxu1 }
  0xe2   : > { %531 = vst.msk [vmem:[%s809_s26 + $0xa8] sm:$0xff] %vm509_vm2, %v466_v50  ;;  %v487_v54 = vadd.f32 %v687_v53, %v804_v18  ;;  %v414_v55 = vpop.f32.mrf.mxu0 }
  0xe3   : > { %520 = vst.msk [vmem:[%s809_s26 + $0x50] sm:$0xff] %vm509_vm2, %v423_v52  ;;  %v415_v56 = vadd.f32 %v804_v18, %v414_v55  ;;  %v478_v57 = vpop.f32.mrf.mxu1 }
  0xe4   : > { %536 = vst.msk [vmem:[%s809_s26 + $0xd0] sm:$0xff] %vm509_vm2, %v487_v54  ;;  %v479_v58 = vadd.f32 %v804_v18, %v478_v57  ;;  %v672_v59 = vpop.f32.mrf.mxu0 }
  0xe5   : > { %518 = vst.msk [vmem:[%s809_s26 + $0x40] sm:$0xff] %vm509_vm2, %v415_v56  ;;  %v426_v60 = vadd.f32 %v672_v59, %v804_v18  ;;  %v688_v61 = vpop.f32.mrf.mxu1 }
  0xe6   : > { %534 = vst.msk [vmem:[%s809_s26 + $0xc0] sm:$0xff] %vm509_vm2, %v479_v58  ;;  %v490_v62 = vadd.f32 %v688_v61, %v804_v18  ;;  %v417_v63 = vpop.f32.mrf.mxu0 }
  0xe7   : > { %521 = vst.msk [vmem:[%s809_s26 + $0x58] sm:$0xff] %vm509_vm2, %v426_v60  ;;  %v418_v0 = vadd.f32 %v804_v18, %v417_v63  ;;  %v481_v1 = vpop.f32.mrf.mxu1 }
  0xe8   : > { %537 = vst.msk [vmem:[%s809_s26 + $0xd8] sm:$0xff] %vm509_vm2, %v490_v62  ;;  %v482_v2 = vadd.f32 %v804_v18, %v481_v1  ;;  %v675_v3 = vpop.f32.mrf.mxu0 }
  0xe9   : > { %519 = vst.msk [vmem:[%s809_s26 + $0x48] sm:$0xff] %vm509_vm2, %v418_v0  ;;  %v439_v4 = vadd.f32 %v675_v3, %v804_v18  ;;  %v691_v5 = vpop.f32.mrf.mxu1 }
  0xea   : > { %535 = vst.msk [vmem:[%s809_s26 + $0xc8] sm:$0xff] %vm509_vm2, %v482_v2  ;;  %v503_v6 = vadd.f32 %v691_v5, %v804_v18  ;;  %v430_v7 = vpop.f32.mrf.mxu0 }
  0xeb   : > { %524 = vst.msk [vmem:[%s809_s26 + $0x70] sm:$0xff] %vm509_vm2, %v439_v4  ;;  %v431_v8 = vadd.f32 %v804_v18, %v430_v7  ;;  %v494_v9 = vpop.f32.mrf.mxu1 }
  0xec   : > { %540 = vst.msk [vmem:[%s809_s26 + $0xf0] sm:$0xff] %vm509_vm2, %v503_v6  ;;  %v495_v10 = vadd.f32 %v804_v18, %v494_v9  ;;  %v676_v11 = vpop.f32.mrf.mxu0 }
  0xed   : > { %522 = vst.msk [vmem:[%s809_s26 + $0x60] sm:$0xff] %vm509_vm2, %v431_v8  ;;  %v442_v12 = vadd.f32 %v676_v11, %v804_v18  ;;  %v692_v13 = vpop.f32.mrf.mxu1 }
  0xee   : > { %538 = vst.msk [vmem:[%s809_s26 + $0xe0] sm:$0xff] %vm509_vm2, %v495_v10  ;;  %v506_v14 = vadd.f32 %v692_v13, %v804_v18  ;;  %v433_v15 = vpop.f32.mrf.mxu0 }
  0xef   : > { %525 = vst.msk [vmem:[%s809_s26 + $0x78] sm:$0xff] %vm509_vm2, %v442_v12  ;;  %v434_v16 = vadd.f32 %v804_v18, %v433_v15  ;;  %v497_v17 = vpop.f32.mrf.mxu1 }
  0xf0   : > { %541 = vst.msk [vmem:[%s809_s26 + $0xf8] sm:$0xff] %vm509_vm2, %v506_v14  ;;  %v498_v19 = vadd.f32 %v804_v18, %v497_v17 }
  0xf1   : > { %523 = vst.msk [vmem:[%s809_s26 + $0x68] sm:$0xff] %vm509_vm2, %v434_v16 }
  0xf2   : > { %539 = vst.msk [vmem:[%s809_s26 + $0xe8] sm:$0xff] %vm509_vm2, %v498_v19 }
  0xf3 PF: > { %s13_s12 = sadd.s32 1, %s727_s12  }
  0xf4   : > { %p10_p4 = scmp.ge.s32.totalorder %s13_s12, 4  }
  0xf6   :  { %12 = sbr.rel (!%p10_p4) target bundleno = 1 (0x1), region = 62 }

// kernel: fno_block2d_amplitude_forward.11
= control target key start
LH: loop header
LB: loop body
LE: loop exit
PB: predicated region body
PF: predicated region fallthrough
CT: control target
= control target key end

     0   :  { %s3061_s9 = smov 0   ;;  %s3452_s0 = inlined_call_operand.vmem [shape: bf16[72,8,32], index: 0, kind: input, shape index: {}]   ;;  %s3453_s1 = inlined_call_operand.vmem [shape: bf16[72,32,32], index: 1, kind: input, shape index: {}]   ;;  %s3454_s2 = inlined_call_operand.vmem [shape: f32[72,8,32], index: 2, kind: output, shape index: {}]  }
   0x1 LB: > { %s2438_s10 = sadd.s32 4294967295, %s3042_s9   ;;  %p2442_p0 = scmp.ge.s32.totalorder %s3042_s9, 1  ;;  %s3042_s9 = sphi %s3061_s9, %s12_s9  }
   0x2   : > { %p125_p1 = scmp.lt.s32.totalorder %s3042_s9, 3 }
   0x4   : > { %p126_p2 = pnand %p2442_p0, %p125_p1 }
   0x5   : > { %s153_s11 = smul.u32 (!%p126_p2), 36, %s2438_s10 }
   0x6   : > { %129 = sbr.rel (%p126_p2) target bundleno = 357 (0x165), region = 28 }
   0x7   : > { %p154_p3 = scmp.lt.s32.totalorder (!%p126_p2), %s153_s11, 71 }
   0xb   : > { %v3044_v0 = vmov 0.0   ;;  %vm3045_vm0 = vmmov 0   ;;  %s3456_s11 = smov (!%p154_p3, %s153_s11), 71  ;;  %vm365_vm1 = vcmask 261120  }
   0xc   : > { %2666 = vmatprep.subr.bf16.mxu0 %v3044_v0  ;;  %2674 = vmatprep.subr.bf16.mxu1 %v3044_v0  ;;  %s2557_s12 = sshll.u32 %s3456_s11, 4  ;;  %s2443_s13 = sshll.u32 %s3456_s11, 2 }
   0xd   : > { %2670 = vmatprep.mubr.msk.bf16.mxu0 %vm3045_vm0, %v3044_v0  ;;  %2678 = vmatprep.mubr.msk.bf16.mxu1 %vm3045_vm0, %v3044_v0  ;;  %s3082_s16 = scalar_lea.vmem %s3453_s1, %s2557_s12  ;;  %s3089_s19 = scalar_lea.vmem %s3452_s0, %s2443_s13 }
   0xe   : > { %v2964_v1 = vld [vmem:[%s3082_s16 + $0x8] sm:$0xff]   ;;  %v2965_v2 = vld [vmem:[%s3082_s16 + $0x18] sm:$0xff]   ;;  %v2966_v3 = vld [vmem:[%s3082_s16] sm:$0xff]   ;;  %s2446_s20 = sshll.u32 %s3456_s11, 3 }
   0xf   : > { %2667 = vmatpush3.bf16.msra.mxu0 %v2964_v1  ;;  %2675 = vmatpush3.bf16.msra.mxu1 %v2965_v2  ;;  %v2967_v4 = vld [vmem:[%s3082_s16 + $0x10] sm:$0xff]   ;;  %v173_v5 = vld [vmem:[%s3089_s19] sm:$0xf]  ;;  %v174_v6 = vld [vmem:[%s3089_s19 + $0x4] sm:$0xf]  ;;  %s3375_s23 = scalar_lea.vmem %s3454_s2, %s2446_s20 }
  0x10   : > { %2668 = vmatprep.subr.bf16.mxu0 %v3044_v0  ;;  %2676 = vmatprep.subr.bf16.mxu1 %v3044_v0  ;;  %v2968_v7 = vld [vmem:[%s3082_s16 + $0x28] sm:$0xff]   ;;  %v2969_v8 = vld [vmem:[%s3082_s16 + $0x38] sm:$0xff]   ;;  %v2970_v9 = vld [vmem:[%s3082_s16 + $0x20] sm:$0xff]  }
  0x11   : > { %v2971_v10 = vld [vmem:[%s3082_s16 + $0x30] sm:$0xff]   ;;  %v175_v11 = vld [vmem:[%s3089_s19 + $0x8] sm:$0xf]  ;;  %v176_v12 = vld [vmem:[%s3089_s19 + $0xc] sm:$0xf] }
  0x12   : > { %v2972_v13 = vld [vmem:[%s3082_s16 + $0x48] sm:$0xff]   ;;  %v2973_v14 = vld [vmem:[%s3082_s16 + $0x58] sm:$0xff]   ;;  %v2974_v15 = vld [vmem:[%s3082_s16 + $0x40] sm:$0xff]  }
  0x13   : > { %2669 = vmatpush3.bf16.msra.mxu0 %v2966_v3  ;;  %2677 = vmatpush3.bf16.msra.mxu1 %v2967_v4  ;;  %v2975_v16 = vld [vmem:[%s3082_s16 + $0x50] sm:$0xff]   ;;  %v2976_v19 = vld [vmem:[%s3082_s16 + $0x68] sm:$0xff]   ;;  %v2977_v20 = vld [vmem:[%s3082_s16 + $0x78] sm:$0xff]  }
  0x14   : > { %2682 = vmatprep.subr.bf16.mxu0 %v3044_v0  ;;  %2690 = vmatprep.subr.bf16.mxu1 %v3044_v0  ;;  %v177_v17 = vld [vmem:[%s3089_s19 + $0x10] sm:$0xf]  ;;  %v178_v18 = vld [vmem:[%s3089_s19 + $0x14] sm:$0xf]  ;;  %v2978_v21 = vld [vmem:[%s3082_s16 + $0x60] sm:$0xff]  }
  0x15   : > { %v2979_v22 = vld [vmem:[%s3082_s16 + $0x70] sm:$0xff]   ;;  %v179_v23 = vld [vmem:[%s3089_s19 + $0x18] sm:$0xf]  ;;  %v180_v24 = vld [vmem:[%s3089_s19 + $0x1c] sm:$0xf] }
  0x16   : > { %2671 = vmatmul.mubr.msk.bf16.vlgmr.msra.gmra.mxu0 %vm365_vm1, %v173_v5  ;;  %2679 = vmatmul.mubr.msk.bf16.vlgmr.msra.gmra.mxu1 %vm365_vm1, %v174_v6  ;;  %v2980_v25 = vld [vmem:[%s3082_s16 + $0x88] sm:$0xff]   ;;  %v2981_v26 = vld [vmem:[%s3082_s16 + $0x98] sm:$0xff]   ;;  %v2982_v27 = vld [vmem:[%s3082_s16 + $0x80] sm:$0xff]  }
  0x17   : > { %2683 = vmatpush3.bf16.msra.mxu0 %v2968_v7  ;;  %2691 = vmatpush3.bf16.msra.mxu1 %v2969_v8  ;;  %v2983_v28 = vld [vmem:[%s3082_s16 + $0x90] sm:$0xff]   ;;  %v181_v29 = vld [vmem:[%s3089_s19 + $0x20] sm:$0xf]  ;;  %v182_v30 = vld [vmem:[%s3089_s19 + $0x24] sm:$0xf] }
  0x18   : > { %2684 = vmatprep.subr.bf16.mxu0 %v3044_v0  ;;  %2692 = vmatprep.subr.bf16.mxu1 %v3044_v0  ;;  %v2984_v31 = vld [vmem:[%s3082_s16 + $0xa8] sm:$0xff]   ;;  %v2985_v32 = vld [vmem:[%s3082_s16 + $0xb8] sm:$0xff]   ;;  %v2986_v33 = vld [vmem:[%s3082_s16 + $0xa0] sm:$0xff]  }
  0x19   : > { %2686 = vmatprep.mubr.msk.bf16.mxu0 %vm3045_vm0, %v3044_v0  ;;  %2694 = vmatprep.mubr.msk.bf16.mxu1 %vm3045_vm0, %v3044_v0  ;;  %v2987_v34 = vld [vmem:[%s3082_s16 + $0xb0] sm:$0xff]   ;;  %v183_v35 = vld [vmem:[%s3089_s19 + $0x28] sm:$0xf]  ;;  %v184_v36 = vld [vmem:[%s3089_s19 + $0x2c] sm:$0xf] }
  0x1a   : > { %v2988_v37 = vld [vmem:[%s3082_s16 + $0xc8] sm:$0xff]   ;;  %v2989_v38 = vld [vmem:[%s3082_s16 + $0xd8] sm:$0xff]   ;;  %v2990_v39 = vld [vmem:[%s3082_s16 + $0xc0] sm:$0xff]  }
  0x1b   : > { %2685 = vmatpush3.bf16.msra.mxu0 %v2970_v9  ;;  %2693 = vmatpush3.bf16.msra.mxu1 %v2971_v10  ;;  %v2991_v40 = vld [vmem:[%s3082_s16 + $0xd0] sm:$0xff]   ;;  %v2992_v42 = vld [vmem:[%s3082_s16 + $0xe8] sm:$0xff]   ;;  %v2993_v44 = vld [vmem:[%s3082_s16 + $0xf8] sm:$0xff]  }
  0x1c   : > { %2698 = vmatprep.subr.bf16.mxu0 %v3044_v0  ;;  %2706 = vmatprep.subr.bf16.mxu1 %v3044_v0  ;;  %v185_v41 = vld [vmem:[%s3089_s19 + $0x30] sm:$0xf]  ;;  %v186_v43 = vld [vmem:[%s3089_s19 + $0x34] sm:$0xf]  ;;  %v2994_v45 = vld [vmem:[%s3082_s16 + $0xe0] sm:$0xff]  }
  0x1d   : > { %v2995_v46 = vld [vmem:[%s3082_s16 + $0xf0] sm:$0xff]   ;;  %v187_v47 = vld [vmem:[%s3089_s19 + $0x38] sm:$0xf]  ;;  %v188_v48 = vld [vmem:[%s3089_s19 + $0x3c] sm:$0xf] }
  0x1e   : > { %2687 = vmatmul.mubr.msk.bf16.vlgmr.msra.gmra.mxu0 %vm365_vm1, %v175_v11  ;;  %2695 = vmatmul.mubr.msk.bf16.vlgmr.msra.gmra.mxu1 %vm365_vm1, %v176_v12  ;;  %v2996_v49 = vld [vmem:[%s3082_s16 + $0x108] sm:$0xff]   ;;  %v2997_v50 = vld [vmem:[%s3082_s16 + $0x118] sm:$0xff]   ;;  %v2998_v51 = vld [vmem:[%s3082_s16 + $0x100] sm:$0xff]  }
  0x1f   : > { %2699 = vmatpush3.bf16.msra.mxu0 %v2972_v13  ;;  %2707 = vmatpush3.bf16.msra.mxu1 %v2973_v14  ;;  %v2999_v52 = vld [vmem:[%s3082_s16 + $0x110] sm:$0xff]   ;;  %v189_v53 = vld [vmem:[%s3089_s19 + $0x40] sm:$0xf]  ;;  %v190_v54 = vld [vmem:[%s3089_s19 + $0x44] sm:$0xf] }
  0x20   : > { %2700 = vmatprep.subr.bf16.mxu0 %v3044_v0  ;;  %2708 = vmatprep.subr.bf16.mxu1 %v3044_v0  ;;  %v3000_v55 = vld [vmem:[%s3082_s16 + $0x128] sm:$0xff]   ;;  %v3001_v56 = vld [vmem:[%s3082_s16 + $0x138] sm:$0xff]   ;;  %v3002_v57 = vld [vmem:[%s3082_s16 + $0x120] sm:$0xff]  }
  0x21   : > { %2702 = vmatprep.mubr.msk.bf16.mxu0 %vm3045_vm0, %v3044_v0  ;;  %2710 = vmatprep.mubr.msk.bf16.mxu1 %vm3045_vm0, %v3044_v0  ;;  %v3003_v58 = vld [vmem:[%s3082_s16 + $0x130] sm:$0xff]   ;;  %v191_v59 = vld [vmem:[%s3089_s19 + $0x48] sm:$0xf]  ;;  %v192_v60 = vld [vmem:[%s3089_s19 + $0x4c] sm:$0xf] }
  0x22   : > { %v3004_v61 = vld [vmem:[%s3082_s16 + $0x148] sm:$0xff]   ;;  %v3005_v62 = vld [vmem:[%s3082_s16 + $0x158] sm:$0xff]   ;;  %v3006_v63 = vld [vmem:[%s3082_s16 + $0x140] sm:$0xff]  }
  0x23   : > { %2701 = vmatpush3.bf16.msra.mxu0 %v2974_v15  ;;  %2709 = vmatpush3.bf16.msra.mxu1 %v2975_v16  ;;  %v3007_v1 = vld [vmem:[%s3082_s16 + $0x150] sm:$0xff]   ;;  %v3008_v3 = vld [vmem:[%s3082_s16 + $0x168] sm:$0xff]   ;;  %v3009_v5 = vld [vmem:[%s3082_s16 + $0x178] sm:$0xff]  }
  0x24   : > { %2714 = vmatprep.subr.bf16.mxu0 %v3044_v0  ;;  %2722 = vmatprep.subr.bf16.mxu1 %v3044_v0  ;;  %v193_v2 = vld [vmem:[%s3089_s19 + $0x50] sm:$0xf]  ;;  %v194_v4 = vld [vmem:[%s3089_s19 + $0x54] sm:$0xf]  ;;  %v3010_v6 = vld [vmem:[%s3082_s16 + $0x160] sm:$0xff]  }
  0x25   : > { %v3011_v7 = vld [vmem:[%s3082_s16 + $0x170] sm:$0xff]   ;;  %v195_v8 = vld [vmem:[%s3089_s19 + $0x58] sm:$0xf]  ;;  %v3012_v9 = vld [vmem:[%s3082_s16 + $0x188] sm:$0xff]  }
  0x26   : > { %2703 = vmatmul.mubr.msk.bf16.vlgmr.msra.gmra.mxu0 %vm365_vm1, %v177_v17  ;;  %2711 = vmatmul.mubr.msk.bf16.vlgmr.msra.gmra.mxu1 %vm365_vm1, %v178_v18  ;;  %v196_v10 = vld [vmem:[%s3089_s19 + $0x5c] sm:$0xf]  ;;  %v3014_v12 = vld [vmem:[%s3082_s16 + $0x180] sm:$0xff]   ;;  %v3015_v13 = vld [vmem:[%s3082_s16 + $0x190] sm:$0xff]  }
  0x27   : > { %2715 = vmatpush3.bf16.msra.mxu0 %v2976_v19  ;;  %2723 = vmatpush3.bf16.msra.mxu1 %v2977_v20  ;;  %v3013_v11 = vld [vmem:[%s3082_s16 + $0x198] sm:$0xff]   ;;  %v197_v14 = vld [vmem:[%s3089_s19 + $0x60] sm:$0xf]  ;;  %v3016_v15 = vld [vmem:[%s3082_s16 + $0x1a8] sm:$0xff]  }
  0x28   : > { %2716 = vmatprep.subr.bf16.mxu0 %v3044_v0  ;;  %2724 = vmatprep.subr.bf16.mxu1 %v3044_v0  ;;  %v198_v16 = vld [vmem:[%s3089_s19 + $0x64] sm:$0xf]  ;;  %v3017_v17 = vld [vmem:[%s3082_s16 + $0x1b8] sm:$0xff]   ;;  %v3019_v19 = vld [vmem:[%s3082_s16 + $0x1b0] sm:$0xff]  }
  0x29   : > { %2718 = vmatprep.mubr.msk.bf16.mxu0 %vm3045_vm0, %v3044_v0  ;;  %2726 = vmatprep.mubr.msk.bf16.mxu1 %vm3045_vm0, %v3044_v0  ;;  %v3018_v18 = vld [vmem:[%s3082_s16 + $0x1a0] sm:$0xff]   ;;  %v199_v20 = vld [vmem:[%s3089_s19 + $0x68] sm:$0xf] }
  0x2b   : > { %2717 = vmatpush3.bf16.msra.mxu0 %v2978_v21  ;;  %2725 = vmatpush3.bf16.msra.mxu1 %v2979_v22  ;;  %v3020_v21 = vld [vmem:[%s3082_s16 + $0x1c8] sm:$0xff]  }
  0x2c   : > { %2730 = vmatprep.subr.bf16.mxu0 %v3044_v0  ;;  %2738 = vmatprep.subr.bf16.mxu1 %v3044_v0  ;;  %v200_v22 = vld [vmem:[%s3089_s19 + $0x6c] sm:$0xf] }
  0x2e   : > { %2719 = vmatmul.mubr.msk.bf16.vlgmr.msra.gmra.mxu0 %vm365_vm1, %v179_v23  ;;  %2727 = vmatmul.mubr.msk.bf16.vlgmr.msra.gmra.mxu1 %vm365_vm1, %v180_v24  ;;  %v3021_v23 = vld [vmem:[%s3082_s16 + $0x1d8] sm:$0xff]   ;;  %v3022_v24 = vld [vmem:[%s3082_s16 + $0x1c0] sm:$0xff]  }
  0x2f   : > { %2731 = vmatpush3.bf16.msra.mxu0 %v2980_v25  ;;  %2739 = vmatpush3.bf16.msra.mxu1 %v2981_v26  ;;  %v3023_v25 = vld [vmem:[%s3082_s16 + $0x1d0] sm:$0xff]  }
  0x30   : > { %2732 = vmatprep.subr.bf16.mxu0 %v3044_v0  ;;  %2740 = vmatprep.subr.bf16.mxu1 %v3044_v0  ;;  %v201_v26 = vld [vmem:[%s3089_s19 + $0x70] sm:$0xf] }
  0x31   : > { %2734 = vmatprep.mubr.msk.bf16.mxu0 %vm3045_vm0, %v3044_v0  ;;  %2742 = vmatprep.mubr.msk.bf16.mxu1 %vm3045_vm0, %v3044_v0 }
  0x33   : > { %2733 = vmatpush3.bf16.msra.mxu0 %v2982_v27  ;;  %2741 = vmatpush3.bf16.msra.mxu1 %v2983_v28  ;;  %v3024_v27 = vld [vmem:[%s3082_s16 + $0x1e8] sm:$0xff]   ;;  %v202_v28 = vld [vmem:[%s3089_s19 + $0x74] sm:$0xf] }
  0x34   : > { %2746 = vmatprep.subr.bf16.mxu0 %v3044_v0  ;;  %2754 = vmatprep.subr.bf16.mxu1 %v3044_v0 }
  0x36   : > { %2735 = vmatmul.mubr.msk.bf16.vlgmr.msra.gmra.mxu0 %vm365_vm1, %v181_v29  ;;  %2743 = vmatmul.mubr.msk.bf16.vlgmr.msra.gmra.mxu1 %vm365_vm1, %v182_v30  ;;  %v3025_v29 = vld [vmem:[%s3082_s16 + $0x1f8] sm:$0xff]   ;;  %v3026_v30 = vld [vmem:[%s3082_s16 + $0x1e0] sm:$0xff]  }
  0x37   : > { %2747 = vmatpush3.bf16.msra.mxu0 %v2984_v31  ;;  %2755 = vmatpush3.bf16.msra.mxu1 %v2985_v32  ;;  %v3027_v31 = vld [vmem:[%s3082_s16 + $0x1f0] sm:$0xff]   ;;  %v203_v32 = vld [vmem:[%s3089_s19 + $0x78] sm:$0xf] }
  0x38   : > { %2748 = vmatprep.subr.bf16.mxu0 %v3044_v0  ;;  %2756 = vmatprep.subr.bf16.mxu1 %v3044_v0 }
  0x39   : > { %2750 = vmatprep.mubr.msk.bf16.mxu0 %vm3045_vm0, %v3044_v0  ;;  %2758 = vmatprep.mubr.msk.bf16.mxu1 %vm3045_vm0, %v3044_v0 }
  0x3b   : > { %2749 = vmatpush3.bf16.msra.mxu0 %v2986_v33  ;;  %2757 = vmatpush3.bf16.msra.mxu1 %v2987_v34  ;;  %v3028_v33 = vld [vmem:[%s3082_s16 + $0x208] sm:$0xff]   ;;  %v204_v34 = vld [vmem:[%s3089_s19 + $0x7c] sm:$0xf] }
  0x3c   : > { %2762 = vmatprep.subr.bf16.mxu0 %v3044_v0  ;;  %2770 = vmatprep.subr.bf16.mxu1 %v3044_v0 }
  0x3e   : > { %2751 = vmatmul.mubr.msk.bf16.vlgmr.msra.gmra.mxu0 %vm365_vm1, %v183_v35  ;;  %2759 = vmatmul.mubr.msk.bf16.vlgmr.msra.gmra.mxu1 %vm365_vm1, %v184_v36  ;;  %v3029_v35 = vld [vmem:[%s3082_s16 + $0x218] sm:$0xff]   ;;  %v3030_v36 = vld [vmem:[%s3082_s16 + $0x200] sm:$0xff]  }
  0x3f   : > { %2763 = vmatpush3.bf16.msra.mxu0 %v2988_v37  ;;  %2771 = vmatpush3.bf16.msra.mxu1 %v2989_v38  ;;  %v3031_v37 = vld [vmem:[%s3082_s16 + $0x210] sm:$0xff]   ;;  %v205_v38 = vld [vmem:[%s3089_s19 + $0x80] sm:$0xf] }
  0x40   : > { %2764 = vmatprep.subr.bf16.mxu0 %v3044_v0  ;;  %2772 = vmatprep.subr.bf16.mxu1 %v3044_v0 }
  0x41   : > { %2766 = vmatprep.mubr.msk.bf16.mxu0 %vm3045_vm0, %v3044_v0  ;;  %2774 = vmatprep.mubr.msk.bf16.mxu1 %vm3045_vm0, %v3044_v0 }
  0x43   : > { %2765 = vmatpush3.bf16.msra.mxu0 %v2990_v39  ;;  %2773 = vmatpush3.bf16.msra.mxu1 %v2991_v40  ;;  %v3032_v39 = vld [vmem:[%s3082_s16 + $0x228] sm:$0xff]   ;;  %v206_v40 = vld [vmem:[%s3089_s19 + $0x84] sm:$0xf] }
  0x44   : > { %2778 = vmatprep.subr.bf16.mxu0 %v3044_v0  ;;  %2786 = vmatprep.subr.bf16.mxu1 %v3044_v0 }
  0x46   : > { %2767 = vmatmul.mubr.msk.bf16.vlgmr.msra.gmra.mxu0 %vm365_vm1, %v185_v41  ;;  %2775 = vmatmul.mubr.msk.bf16.vlgmr.msra.gmra.mxu1 %vm365_vm1, %v186_v43  ;;  %v3033_v41 = vld [vmem:[%s3082_s16 + $0x238] sm:$0xff]   ;;  %v3035_v43 = vld [vmem:[%s3082_s16 + $0x230] sm:$0xff]  }
  0x47   : > { %2779 = vmatpush3.bf16.msra.mxu0 %v2992_v42  ;;  %2787 = vmatpush3.bf16.msra.mxu1 %v2993_v44  ;;  %v3034_v42 = vld [vmem:[%s3082_s16 + $0x220] sm:$0xff]   ;;  %v207_v44 = vld [vmem:[%s3089_s19 + $0x88] sm:$0xf] }
  0x48   : > { %2780 = vmatprep.subr.bf16.mxu0 %v3044_v0  ;;  %2788 = vmatprep.subr.bf16.mxu1 %v3044_v0 }
  0x49   : > { %2782 = vmatprep.mubr.msk.bf16.mxu0 %vm3045_vm0, %v3044_v0  ;;  %2790 = vmatprep.mubr.msk.bf16.mxu1 %vm3045_vm0, %v3044_v0 }
  0x4b   : > { %2781 = vmatpush3.bf16.msra.mxu0 %v2994_v45  ;;  %2789 = vmatpush3.bf16.msra.mxu1 %v2995_v46  ;;  %v208_v45 = vld [vmem:[%s3089_s19 + $0x8c] sm:$0xf] }
  0x4c   : > { %2794 = vmatprep.subr.bf16.mxu0 %v3044_v0  ;;  %2802 = vmatprep.subr.bf16.mxu1 %v3044_v0 }
  0x4e   : > { %2783 = vmatmul.mubr.msk.bf16.vlgmr.msra.gmra.mxu0 %vm365_vm1, %v187_v47  ;;  %2791 = vmatmul.mubr.msk.bf16.vlgmr.msra.gmra.mxu1 %vm365_vm1, %v188_v48 }
  0x4f   : > { %2795 = vmatpush3.bf16.msra.mxu0 %v2996_v49  ;;  %2803 = vmatpush3.bf16.msra.mxu1 %v2997_v50 }
  0x50   : > { %2796 = vmatprep.subr.bf16.mxu0 %v3044_v0  ;;  %2804 = vmatprep.subr.bf16.mxu1 %v3044_v0 }
  0x51   : > { %2798 = vmatprep.mubr.msk.bf16.mxu0 %vm3045_vm0, %v3044_v0  ;;  %2806 = vmatprep.mubr.msk.bf16.mxu1 %vm3045_vm0, %v3044_v0 }
  0x53   : > { %2797 = vmatpush3.bf16.msra.mxu0 %v2998_v51  ;;  %2805 = vmatpush3.bf16.msra.mxu1 %v2999_v52 }
  0x54   : > { %2810 = vmatprep.subr.bf16.mxu0 %v3044_v0  ;;  %2818 = vmatprep.subr.bf16.mxu1 %v3044_v0 }
  0x56   : > { %2799 = vmatmul.mubr.msk.bf16.vlgmr.msra.gmra.mxu0 %vm365_vm1, %v189_v53  ;;  %2807 = vmatmul.mubr.msk.bf16.vlgmr.msra.gmra.mxu1 %vm365_vm1, %v190_v54 }
  0x57   : > { %2811 = vmatpush3.bf16.msra.mxu0 %v3000_v55  ;;  %2819 = vmatpush3.bf16.msra.mxu1 %v3001_v56 }
  0x58   : > { %2812 = vmatprep.subr.bf16.mxu0 %v3044_v0  ;;  %2820 = vmatprep.subr.bf16.mxu1 %v3044_v0 }
  0x59   : > { %2814 = vmatprep.mubr.msk.bf16.mxu0 %vm3045_vm0, %v3044_v0  ;;  %2822 = vmatprep.mubr.msk.bf16.mxu1 %vm3045_vm0, %v3044_v0 }
  0x5b   : > { %2813 = vmatpush3.bf16.msra.mxu0 %v3002_v57  ;;  %2821 = vmatpush3.bf16.msra.mxu1 %v3003_v58 }
  0x5c   : > { %2826 = vmatprep.subr.bf16.mxu0 %v3044_v0  ;;  %2834 = vmatprep.subr.bf16.mxu1 %v3044_v0 }
  0x5e   : > { %2815 = vmatmul.mubr.msk.bf16.vlgmr.msra.gmra.mxu0 %vm365_vm1, %v191_v59  ;;  %2823 = vmatmul.mubr.msk.bf16.vlgmr.msra.gmra.mxu1 %vm365_vm1, %v192_v60 }
  0x5f   : > { %2827 = vmatpush3.bf16.msra.mxu0 %v3004_v61  ;;  %2835 = vmatpush3.bf16.msra.mxu1 %v3005_v62 }
  0x60   : > { %2828 = vmatprep.subr.bf16.mxu0 %v3044_v0  ;;  %2836 = vmatprep.subr.bf16.mxu1 %v3044_v0 }
  0x61   : > { %2830 = vmatprep.mubr.msk.bf16.mxu0 %vm3045_vm0, %v3044_v0  ;;  %2838 = vmatprep.mubr.msk.bf16.mxu1 %vm3045_vm0, %v3044_v0 }
  0x63   : > { %2829 = vmatpush3.bf16.msra.mxu0 %v3006_v63  ;;  %2837 = vmatpush3.bf16.msra.mxu1 %v3007_v1 }
  0x64   : > { %2842 = vmatprep.subr.bf16.mxu0 %v3044_v0  ;;  %2850 = vmatprep.subr.bf16.mxu1 %v3044_v0 }
  0x66   : > { %2831 = vmatmul.mubr.msk.bf16.vlgmr.msra.gmra.mxu0 %vm365_vm1, %v193_v2  ;;  %2839 = vmatmul.mubr.msk.bf16.vlgmr.msra.gmra.mxu1 %vm365_vm1, %v194_v4 }
  0x67   : > { %2843 = vmatpush3.bf16.msra.mxu0 %v3008_v3  ;;  %2851 = vmatpush3.bf16.msra.mxu1 %v3009_v5 }
  0x68   : > { %2844 = vmatprep.subr.bf16.mxu0 %v3044_v0  ;;  %2852 = vmatprep.subr.bf16.mxu1 %v3044_v0 }
  0x69   : > { %2846 = vmatprep.mubr.msk.bf16.mxu0 %vm3045_vm0, %v3044_v0  ;;  %2854 = vmatprep.mubr.msk.bf16.mxu1 %vm3045_vm0, %v3044_v0 }
  0x6b   : > { %2845 = vmatpush3.bf16.msra.mxu0 %v3010_v6  ;;  %2853 = vmatpush3.bf16.msra.mxu1 %v3011_v7 }
  0x6c   : > { %2858 = vmatprep.subr.bf16.mxu0 %v3044_v0  ;;  %2866 = vmatprep.subr.bf16.mxu1 %v3044_v0 }
  0x6e   : > { %2847 = vmatmul.mubr.msk.bf16.vlgmr.msra.gmra.mxu0 %vm365_vm1, %v195_v8  ;;  %2855 = vmatmul.mubr.msk.bf16.vlgmr.msra.gmra.mxu1 %vm365_vm1, %v196_v10 }
  0x6f   : > { %2859 = vmatpush3.bf16.msra.mxu0 %v3012_v9  ;;  %2867 = vmatpush3.bf16.msra.mxu1 %v3013_v11 }
  0x70   : > { %2860 = vmatprep.subr.bf16.mxu0 %v3044_v0  ;;  %2868 = vmatprep.subr.bf16.mxu1 %v3044_v0 }
  0x71   : > { %2862 = vmatprep.mubr.msk.bf16.mxu0 %vm3045_vm0, %v3044_v0  ;;  %2870 = vmatprep.mubr.msk.bf16.mxu1 %vm3045_vm0, %v3044_v0 }
  0x73   : > { %2861 = vmatpush3.bf16.msra.mxu0 %v3014_v12  ;;  %2869 = vmatpush3.bf16.msra.mxu1 %v3015_v13 }
  0x74   : > { %2874 = vmatprep.subr.bf16.mxu0 %v3044_v0  ;;  %2882 = vmatprep.subr.bf16.mxu1 %v3044_v0 }
  0x76   : > { %2863 = vmatmul.mubr.msk.bf16.vlgmr.msra.gmra.mxu0 %vm365_vm1, %v197_v14  ;;  %2871 = vmatmul.mubr.msk.bf16.vlgmr.msra.gmra.mxu1 %vm365_vm1, %v198_v16 }
  0x77   : > { %2875 = vmatpush3.bf16.msra.mxu0 %v3016_v15  ;;  %2883 = vmatpush3.bf16.msra.mxu1 %v3017_v17 }
  0x78   : > { %2876 = vmatprep.subr.bf16.mxu0 %v3044_v0  ;;  %2884 = vmatprep.subr.bf16.mxu1 %v3044_v0 }
  0x79   : > { %2878 = vmatprep.mubr.msk.bf16.mxu0 %vm3045_vm0, %v3044_v0  ;;  %2886 = vmatprep.mubr.msk.bf16.mxu1 %vm3045_vm0, %v3044_v0 }
  0x7b   : > { %2877 = vmatpush3.bf16.msra.mxu0 %v3018_v18  ;;  %2885 = vmatpush3.bf16.msra.mxu1 %v3019_v19 }
  0x7c   : > { %2890 = vmatprep.subr.bf16.mxu0 %v3044_v0  ;;  %2898 = vmatprep.subr.bf16.mxu1 %v3044_v0 }
  0x7e   : > { %2879 = vmatmul.mubr.msk.bf16.vlgmr.msra.gmra.mxu0 %vm365_vm1, %v199_v20  ;;  %2887 = vmatmul.mubr.msk.bf16.vlgmr.msra.gmra.mxu1 %vm365_vm1, %v200_v22 }
  0x7f   : > { %2891 = vmatpush3.bf16.msra.mxu0 %v3020_v21  ;;  %2899 = vmatpush3.bf16.msra.mxu1 %v3021_v23 }
  0x80   : > { %2892 = vmatprep.subr.bf16.mxu0 %v3044_v0  ;;  %2900 = vmatprep.subr.bf16.mxu1 %v3044_v0 }
  0x81   : > { %2894 = vmatprep.mubr.msk.bf16.mxu0 %vm3045_vm0, %v3044_v0  ;;  %2902 = vmatprep.mubr.msk.bf16.mxu1 %vm3045_vm0, %v3044_v0 }
  0x83   : > { %2893 = vmatpush3.bf16.msra.mxu0 %v3022_v24  ;;  %2901 = vmatpush3.bf16.msra.mxu1 %v3023_v25 }
  0x84   : > { %2906 = vmatprep.subr.bf16.mxu0 %v3044_v0  ;;  %2914 = vmatprep.subr.bf16.mxu1 %v3044_v0 }
  0x86   : > { %2895 = vmatmul.mubr.msk.bf16.vlgmr.msra.gmra.mxu0 %vm365_vm1, %v201_v26  ;;  %2903 = vmatmul.mubr.msk.bf16.vlgmr.msra.gmra.mxu1 %vm365_vm1, %v202_v28 }
  0x87   : > { %2907 = vmatpush3.bf16.msra.mxu0 %v3024_v27  ;;  %2915 = vmatpush3.bf16.msra.mxu1 %v3025_v29 }
  0x88   : > { %2908 = vmatprep.subr.bf16.mxu0 %v3044_v0  ;;  %2916 = vmatprep.subr.bf16.mxu1 %v3044_v0 }
  0x89   : > { %2910 = vmatprep.mubr.msk.bf16.mxu0 %vm3045_vm0, %v3044_v0  ;;  %2918 = vmatprep.mubr.msk.bf16.mxu1 %vm3045_vm0, %v3044_v0 }
  0x8b   : > { %2909 = vmatpush3.bf16.msra.mxu0 %v3026_v30  ;;  %2917 = vmatpush3.bf16.msra.mxu1 %v3027_v31 }
  0x8c   : > { %2922 = vmatprep.subr.bf16.mxu0 %v3044_v0  ;;  %2930 = vmatprep.subr.bf16.mxu1 %v3044_v0 }
  0x8e   : > { %2911 = vmatmul.mubr.msk.bf16.vlgmr.msra.gmra.mxu0 %vm365_vm1, %v203_v32  ;;  %2919 = vmatmul.mubr.msk.bf16.vlgmr.msra.gmra.mxu1 %vm365_vm1, %v204_v34 }
  0x8f   : > { %2923 = vmatpush3.bf16.msra.mxu0 %v3028_v33  ;;  %2931 = vmatpush3.bf16.msra.mxu1 %v3029_v35 }
  0x90   : > { %2924 = vmatprep.subr.bf16.mxu0 %v3044_v0  ;;  %2932 = vmatprep.subr.bf16.mxu1 %v3044_v0 }
  0x91   : > { %2926 = vmatprep.mubr.msk.bf16.mxu0 %vm3045_vm0, %v3044_v0  ;;  %2934 = vmatprep.mubr.msk.bf16.mxu1 %vm3045_vm0, %v3044_v0 }
  0x93   : > { %2925 = vmatpush3.bf16.msra.mxu0 %v3030_v36  ;;  %2933 = vmatpush3.bf16.msra.mxu1 %v3031_v37 }
  0x94   : > { %2938 = vmatprep.subr.bf16.mxu0 %v3044_v0  ;;  %2946 = vmatprep.subr.bf16.mxu1 %v3044_v0 }
  0x96   : > { %2927 = vmatmul.mubr.msk.bf16.vlgmr.msra.gmra.mxu0 %vm365_vm1, %v205_v38  ;;  %2935 = vmatmul.mubr.msk.bf16.vlgmr.msra.gmra.mxu1 %vm365_vm1, %v206_v40 }
  0x97   : > { %2939 = vmatpush3.bf16.msra.mxu0 %v3032_v39  ;;  %2947 = vmatpush3.bf16.msra.mxu1 %v3033_v41 }
  0x98   : > { %2940 = vmatprep.subr.bf16.mxu0 %v3044_v0  ;;  %2948 = vmatprep.subr.bf16.mxu1 %v3044_v0 }
  0x99   : > { %2942 = vmatprep.mubr.msk.bf16.mxu0 %vm3045_vm0, %v3044_v0  ;;  %2950 = vmatprep.mubr.msk.bf16.mxu1 %vm3045_vm0, %v3044_v0 }
  0x9b   : > { %2941 = vmatpush3.bf16.msra.mxu0 %v3034_v42  ;;  %2949 = vmatpush3.bf16.msra.mxu1 %v3035_v43 }
  0x9e   : > { %2943 = vmatmul.mubr.msk.bf16.vlgmr.msra.gmra.mxu0 %vm365_vm1, %v207_v44  ;;  %2951 = vmatmul.mubr.msk.bf16.vlgmr.msra.gmra.mxu1 %vm365_vm1, %v208_v45 }
  0xd6   : > { %v403_v46 = vpop.f32.mrf.mxu0  ;;  %v458_v0 = vpop.f32.mrf.mxu1 }
  0xd7   : > { %2334 = vst.msk [vmem:[%s3375_s23] sm:$0xff] %vm365_vm1, %v403_v46  ;;  %2335 = vst.msk [vmem:[%s3375_s23 + $0x8] sm:$0xff] %vm365_vm1, %v458_v0 }
  0xd8   : > { %v2672_v47 = vpop.f32.mrf.mxu0  ;;  %v2680_v48 = vpop.f32.mrf.mxu1 }
  0xda   : > { %v406_v49 = vpop.f32.mrf.mxu0  ;;  %v461_v50 = vpop.f32.mrf.mxu1 }
  0xdc   : > { %v2673_v51 = vpop.f32.mrf.mxu0  ;;  %v2681_v52 = vpop.f32.mrf.mxu1 }
  0xde   : > { %v513_v53 = vpop.f32.mrf.mxu0  ;;  %v568_v54 = vpop.f32.mrf.mxu1 }
  0xdf   : > { %2336 = vst.msk [vmem:[%s3375_s23 + $0x10] sm:$0xff] %vm365_vm1, %v513_v53  ;;  %2337 = vst.msk [vmem:[%s3375_s23 + $0x18] sm:$0xff] %vm365_vm1, %v568_v54 }
  0xe0   : > { %v2688_v55 = vpop.f32.mrf.mxu0  ;;  %v2696_v56 = vpop.f32.mrf.mxu1 }
  0xe2   : > { %v516_v57 = vpop.f32.mrf.mxu0  ;;  %v571_v58 = vpop.f32.mrf.mxu1 }
  0xe4   : > { %v2689_v59 = vpop.f32.mrf.mxu0  ;;  %v2697_v60 = vpop.f32.mrf.mxu1 }
  0xe6   : > { %v623_v61 = vpop.f32.mrf.mxu0  ;;  %v678_v62 = vpop.f32.mrf.mxu1 }
  0xe7   : > { %2338 = vst.msk [vmem:[%s3375_s23 + $0x20] sm:$0xff] %vm365_vm1, %v623_v61  ;;  %2339 = vst.msk [vmem:[%s3375_s23 + $0x28] sm:$0xff] %vm365_vm1, %v678_v62 }
  0xe8   : > { %v2704_v63 = vpop.f32.mrf.mxu0  ;;  %v2712_v1 = vpop.f32.mrf.mxu1 }
  0xea   : > { %v626_v2 = vpop.f32.mrf.mxu0  ;;  %v681_v3 = vpop.f32.mrf.mxu1 }
  0xec   : > { %v2705_v4 = vpop.f32.mrf.mxu0  ;;  %v2713_v5 = vpop.f32.mrf.mxu1 }
  0xee   : > { %v733_v6 = vpop.f32.mrf.mxu0  ;;  %v788_v7 = vpop.f32.mrf.mxu1 }
  0xef   : > { %2340 = vst.msk [vmem:[%s3375_s23 + $0x30] sm:$0xff] %vm365_vm1, %v733_v6  ;;  %2341 = vst.msk [vmem:[%s3375_s23 + $0x38] sm:$0xff] %vm365_vm1, %v788_v7 }
  0xf0   : > { %v2720_v8 = vpop.f32.mrf.mxu0  ;;  %v2728_v9 = vpop.f32.mrf.mxu1 }
  0xf2   : > { %v736_v10 = vpop.f32.mrf.mxu0  ;;  %v791_v11 = vpop.f32.mrf.mxu1 }
  0xf4   : > { %v2721_v12 = vpop.f32.mrf.mxu0  ;;  %v2729_v13 = vpop.f32.mrf.mxu1 }
  0xf6   : > { %v843_v14 = vpop.f32.mrf.mxu0  ;;  %v898_v15 = vpop.f32.mrf.mxu1 }
  0xf7   : > { %2342 = vst.msk [vmem:[%s3375_s23 + $0x40] sm:$0xff] %vm365_vm1, %v843_v14  ;;  %2343 = vst.msk [vmem:[%s3375_s23 + $0x48] sm:$0xff] %vm365_vm1, %v898_v15 }
  0xf8   : > { %v2736_v16 = vpop.f32.mrf.mxu0  ;;  %v2744_v17 = vpop.f32.mrf.mxu1 }
  0xfa   : > { %v846_v18 = vpop.f32.mrf.mxu0  ;;  %v901_v19 = vpop.f32.mrf.mxu1 }
  0xfc   : > { %v2737_v20 = vpop.f32.mrf.mxu0  ;;  %v2745_v21 = vpop.f32.mrf.mxu1 }
  0xfe   : > { %v953_v22 = vpop.f32.mrf.mxu0  ;;  %v1008_v23 = vpop.f32.mrf.mxu1 }
  0xff   : > { %2344 = vst.msk [vmem:[%s3375_s23 + $0x50] sm:$0xff] %vm365_vm1, %v953_v22  ;;  %2345 = vst.msk [vmem:[%s3375_s23 + $0x58] sm:$0xff] %vm365_vm1, %v1008_v23 }
 0x100   : > { %v2752_v24 = vpop.f32.mrf.mxu0  ;;  %v2760_v25 = vpop.f32.mrf.mxu1 }
 0x102   : > { %v956_v26 = vpop.f32.mrf.mxu0  ;;  %v1011_v27 = vpop.f32.mrf.mxu1 }
 0x104   : > { %v2753_v28 = vpop.f32.mrf.mxu0  ;;  %v2761_v29 = vpop.f32.mrf.mxu1 }
 0x106   : > { %v1063_v30 = vpop.f32.mrf.mxu0  ;;  %v1118_v31 = vpop.f32.mrf.mxu1 }
 0x107   : > { %2346 = vst.msk [vmem:[%s3375_s23 + $0x60] sm:$0xff] %vm365_vm1, %v1063_v30  ;;  %2347 = vst.msk [vmem:[%s3375_s23 + $0x68] sm:$0xff] %vm365_vm1, %v1118_v31 }
 0x108   : > { %v2768_v32 = vpop.f32.mrf.mxu0  ;;  %v2776_v33 = vpop.f32.mrf.mxu1 }
 0x10a   : > { %v1066_v34 = vpop.f32.mrf.mxu0  ;;  %v1121_v35 = vpop.f32.mrf.mxu1 }
 0x10c   : > { %v2769_v36 = vpop.f32.mrf.mxu0  ;;  %v2777_v37 = vpop.f32.mrf.mxu1 }
 0x10e   : > { %v1173_v38 = vpop.f32.mrf.mxu0  ;;  %v1228_v39 = vpop.f32.mrf.mxu1 }
 0x10f   : > { %2348 = vst.msk [vmem:[%s3375_s23 + $0x70] sm:$0xff] %vm365_vm1, %v1173_v38  ;;  %2349 = vst.msk [vmem:[%s3375_s23 + $0x78] sm:$0xff] %vm365_vm1, %v1228_v39 }
 0x110   : > { %v2784_v40 = vpop.f32.mrf.mxu0  ;;  %v2792_v41 = vpop.f32.mrf.mxu1 }
 0x112   : > { %v1176_v42 = vpop.f32.mrf.mxu0  ;;  %v1231_v43 = vpop.f32.mrf.mxu1 }
 0x114   : > { %v2785_v44 = vpop.f32.mrf.mxu0  ;;  %v2793_v45 = vpop.f32.mrf.mxu1 }
 0x116   : > { %v1283_v46 = vpop.f32.mrf.mxu0  ;;  %v1338_v0 = vpop.f32.mrf.mxu1 }
 0x117   : > { %2350 = vst.msk [vmem:[%s3375_s23 + $0x80] sm:$0xff] %vm365_vm1, %v1283_v46  ;;  %2351 = vst.msk [vmem:[%s3375_s23 + $0x88] sm:$0xff] %vm365_vm1, %v1338_v0 }
 0x118   : > { %v2800_v47 = vpop.f32.mrf.mxu0  ;;  %v2808_v48 = vpop.f32.mrf.mxu1 }
 0x11a   : > { %v1286_v49 = vpop.f32.mrf.mxu0  ;;  %v1341_v50 = vpop.f32.mrf.mxu1 }
 0x11c   : > { %v2801_v51 = vpop.f32.mrf.mxu0  ;;  %v2809_v52 = vpop.f32.mrf.mxu1 }
 0x11e   : > { %v1393_v53 = vpop.f32.mrf.mxu0  ;;  %v1448_v54 = vpop.f32.mrf.mxu1 }
 0x11f   : > { %2352 = vst.msk [vmem:[%s3375_s23 + $0x90] sm:$0xff] %vm365_vm1, %v1393_v53  ;;  %2353 = vst.msk [vmem:[%s3375_s23 + $0x98] sm:$0xff] %vm365_vm1, %v1448_v54 }
 0x120   : > { %v2816_v55 = vpop.f32.mrf.mxu0  ;;  %v2824_v56 = vpop.f32.mrf.mxu1 }
 0x122   : > { %v1396_v57 = vpop.f32.mrf.mxu0  ;;  %v1451_v58 = vpop.f32.mrf.mxu1 }
 0x124   : > { %v2817_v59 = vpop.f32.mrf.mxu0  ;;  %v2825_v60 = vpop.f32.mrf.mxu1 }
 0x126   : > { %v1503_v61 = vpop.f32.mrf.mxu0  ;;  %v1558_v62 = vpop.f32.mrf.mxu1 }
 0x127   : > { %2354 = vst.msk [vmem:[%s3375_s23 + $0xa0] sm:$0xff] %vm365_vm1, %v1503_v61  ;;  %2355 = vst.msk [vmem:[%s3375_s23 + $0xa8] sm:$0xff] %vm365_vm1, %v1558_v62 }
 0x128   : > { %v2832_v63 = vpop.f32.mrf.mxu0  ;;  %v2840_v1 = vpop.f32.mrf.mxu1 }
 0x12a   : > { %v1506_v2 = vpop.f32.mrf.mxu0  ;;  %v1561_v3 = vpop.f32.mrf.mxu1 }
 0x12c   : > { %v2833_v4 = vpop.f32.mrf.mxu0  ;;  %v2841_v5 = vpop.f32.mrf.mxu1 }
 0x12e   : > { %v1613_v6 = vpop.f32.mrf.mxu0  ;;  %v1668_v7 = vpop.f32.mrf.mxu1 }
 0x12f   : > { %2356 = vst.msk [vmem:[%s3375_s23 + $0xb0] sm:$0xff] %vm365_vm1, %v1613_v6  ;;  %2357 = vst.msk [vmem:[%s3375_s23 + $0xb8] sm:$0xff] %vm365_vm1, %v1668_v7 }
 0x130   : > { %v2848_v8 = vpop.f32.mrf.mxu0  ;;  %v2856_v9 = vpop.f32.mrf.mxu1 }
 0x132   : > { %v1616_v10 = vpop.f32.mrf.mxu0  ;;  %v1671_v11 = vpop.f32.mrf.mxu1 }
 0x134   : > { %v2849_v12 = vpop.f32.mrf.mxu0  ;;  %v2857_v13 = vpop.f32.mrf.mxu1 }
 0x136   : > { %v1723_v14 = vpop.f32.mrf.mxu0  ;;  %v1778_v15 = vpop.f32.mrf.mxu1 }
 0x137   : > { %2358 = vst.msk [vmem:[%s3375_s23 + $0xc0] sm:$0xff] %vm365_vm1, %v1723_v14  ;;  %2359 = vst.msk [vmem:[%s3375_s23 + $0xc8] sm:$0xff] %vm365_vm1, %v1778_v15 }
 0x138   : > { %v2864_v16 = vpop.f32.mrf.mxu0  ;;  %v2872_v17 = vpop.f32.mrf.mxu1 }
 0x13a   : > { %v1726_v18 = vpop.f32.mrf.mxu0  ;;  %v1781_v19 = vpop.f32.mrf.mxu1 }
 0x13c   : > { %v2865_v20 = vpop.f32.mrf.mxu0  ;;  %v2873_v21 = vpop.f32.mrf.mxu1 }
 0x13e   : > { %v1833_v22 = vpop.f32.mrf.mxu0  ;;  %v1888_v23 = vpop.f32.mrf.mxu1 }
 0x13f   : > { %2360 = vst.msk [vmem:[%s3375_s23 + $0xd0] sm:$0xff] %vm365_vm1, %v1833_v22  ;;  %2361 = vst.msk [vmem:[%s3375_s23 + $0xd8] sm:$0xff] %vm365_vm1, %v1888_v23 }
 0x140   : > { %v2880_v24 = vpop.f32.mrf.mxu0  ;;  %v2888_v25 = vpop.f32.mrf.mxu1 }
 0x142   : > { %v1836_v26 = vpop.f32.mrf.mxu0  ;;  %v1891_v27 = vpop.f32.mrf.mxu1 }
 0x144   : > { %v2881_v28 = vpop.f32.mrf.mxu0  ;;  %v2889_v29 = vpop.f32.mrf.mxu1 }
 0x146   : > { %v1943_v30 = vpop.f32.mrf.mxu0  ;;  %v1998_v31 = vpop.f32.mrf.mxu1 }
 0x147   : > { %2362 = vst.msk [vmem:[%s3375_s23 + $0xe0] sm:$0xff] %vm365_vm1, %v1943_v30  ;;  %2363 = vst.msk [vmem:[%s3375_s23 + $0xe8] sm:$0xff] %vm365_vm1, %v1998_v31 }
 0x148   : > { %v2896_v32 = vpop.f32.mrf.mxu0  ;;  %v2904_v33 = vpop.f32.mrf.mxu1 }
 0x14a   : > { %v1946_v34 = vpop.f32.mrf.mxu0  ;;  %v2001_v35 = vpop.f32.mrf.mxu1 }
 0x14c   : > { %v2897_v36 = vpop.f32.mrf.mxu0  ;;  %v2905_v37 = vpop.f32.mrf.mxu1 }
 0x14e   : > { %v2053_v38 = vpop.f32.mrf.mxu0  ;;  %v2108_v39 = vpop.f32.mrf.mxu1 }
 0x14f   : > { %2364 = vst.msk [vmem:[%s3375_s23 + $0xf0] sm:$0xff] %vm365_vm1, %v2053_v38  ;;  %2365 = vst.msk [vmem:[%s3375_s23 + $0xf8] sm:$0xff] %vm365_vm1, %v2108_v39 }
 0x150   : > { %v2912_v40 = vpop.f32.mrf.mxu0  ;;  %v2920_v41 = vpop.f32.mrf.mxu1 }
 0x152   : > { %v2056_v42 = vpop.f32.mrf.mxu0  ;;  %v2111_v43 = vpop.f32.mrf.mxu1 }
 0x154   : > { %v2913_v44 = vpop.f32.mrf.mxu0  ;;  %v2921_v45 = vpop.f32.mrf.mxu1 }
 0x156   : > { %v2163_v46 = vpop.f32.mrf.mxu0  ;;  %v2218_v0 = vpop.f32.mrf.mxu1 }
 0x157   : > { %2366 = vst.msk [vmem:[%s3375_s23 + $0x100] sm:$0xff] %vm365_vm1, %v2163_v46  ;;  %2367 = vst.msk [vmem:[%s3375_s23 + $0x108] sm:$0xff] %vm365_vm1, %v2218_v0 }
 0x158   : > { %v2928_v47 = vpop.f32.mrf.mxu0  ;;  %v2936_v48 = vpop.f32.mrf.mxu1 }
 0x15a   : > { %v2166_v49 = vpop.f32.mrf.mxu0  ;;  %v2221_v50 = vpop.f32.mrf.mxu1 }
 0x15c   : > { %v2929_v51 = vpop.f32.mrf.mxu0  ;;  %v2937_v52 = vpop.f32.mrf.mxu1 }
 0x15e   : > { %v2273_v53 = vpop.f32.mrf.mxu0  ;;  %v2328_v54 = vpop.f32.mrf.mxu1 }
 0x15f   : > { %2368 = vst.msk [vmem:[%s3375_s23 + $0x110] sm:$0xff] %vm365_vm1, %v2273_v53  ;;  %2369 = vst.msk [vmem:[%s3375_s23 + $0x118] sm:$0xff] %vm365_vm1, %v2328_v54 }
 0x160   : > { %v2944_v55 = vpop.f32.mrf.mxu0  ;;  %v2952_v56 = vpop.f32.mrf.mxu1 }
 0x162   : > { %v2276_v57 = vpop.f32.mrf.mxu0  ;;  %v2331_v58 = vpop.f32.mrf.mxu1 }
 0x164   : > { %v2945_v59 = vpop.f32.mrf.mxu0  ;;  %v2953_v60 = vpop.f32.mrf.mxu1 }
 0x165 PF: > { %s12_s9 = sadd.s32 1, %s3042_s9  }
 0x166   : > { %p9_p4 = scmp.ge.s32.totalorder %s12_s9, 4  }
 0x168   :  { %11 = sbr.rel (!%p9_p4) target bundleno = 1 (0x1), region = 61 }

// kernel: reverse.8
= control target key start
LH: loop header
LB: loop body
LE: loop exit
PB: predicated region body
PF: predicated region fallthrough
CT: control target
= control target key end

     0   :  { %s344_s0 = inlined_call_operand.vmem [shape: f32[2,32,16,7], index: 0, kind: input, shape index: {}]   ;;  %s345_s1 = inlined_call_operand.vmem [shape: f32[2,32,16,7], index: 1, kind: output, shape index: {}]  }
   0x1   :  { %v112_v0 = vld [vmem:[%s344_s0 + $0x60] sm:$0xff]  ;;  %v113_v1 = vld [vmem:[%s344_s0 + $0xd0] sm:$0xff]  ;;  %v138_v14 = vld [vmem:[%s344_s0 + $0x68] sm:$0xff] }
   0x2   :  { %v115_v2 = vld [vmem:[%s344_s0 + $0x50] sm:$0xff]  ;;  %4 = vst [vmem:[%s345_s1] sm:$0xff] %v112_v0  ;;  %114 = vst [vmem:[%s345_s1 + $0x70] sm:$0xff] %v113_v1  ;;  %v117_v3 = vld [vmem:[%s344_s0 + $0xc0] sm:$0xff] }
   0x3   :  { %116 = vst [vmem:[%s345_s1 + $0x10] sm:$0xff] %v115_v2  ;;  %v119_v4 = vld [vmem:[%s344_s0 + $0x40] sm:$0xff]  ;;  %v121_v5 = vld [vmem:[%s344_s0 + $0xb0] sm:$0xff]  ;;  %118 = vst [vmem:[%s345_s1 + $0x80] sm:$0xff] %v117_v3 }
   0x4   :  { %120 = vst [vmem:[%s345_s1 + $0x20] sm:$0xff] %v119_v4  ;;  %122 = vst [vmem:[%s345_s1 + $0x90] sm:$0xff] %v121_v5  ;;  %v123_v6 = vld [vmem:[%s344_s0 + $0x30] sm:$0xff]  ;;  %v125_v7 = vld [vmem:[%s344_s0 + $0xa0] sm:$0xff] }
   0x5   :  { %v127_v8 = vld [vmem:[%s344_s0 + $0x20] sm:$0xff]  ;;  %124 = vst [vmem:[%s345_s1 + $0x30] sm:$0xff] %v123_v6  ;;  %126 = vst [vmem:[%s345_s1 + $0xa0] sm:$0xff] %v125_v7  ;;  %v129_v9 = vld [vmem:[%s344_s0 + $0x90] sm:$0xff] }
   0x6   :  { %128 = vst [vmem:[%s345_s1 + $0x40] sm:$0xff] %v127_v8  ;;  %v131_v10 = vld [vmem:[%s344_s0 + $0x10] sm:$0xff]  ;;  %v133_v11 = vld [vmem:[%s344_s0 + $0x80] sm:$0xff]  ;;  %130 = vst [vmem:[%s345_s1 + $0xb0] sm:$0xff] %v129_v9 }
   0x7   :  { %132 = vst [vmem:[%s345_s1 + $0x50] sm:$0xff] %v131_v10  ;;  %134 = vst [vmem:[%s345_s1 + $0xc0] sm:$0xff] %v133_v11  ;;  %v49_v12 = vld [vmem:[%s344_s0] sm:$0xff]  ;;  %v136_v13 = vld [vmem:[%s344_s0 + $0x70] sm:$0xff] }
   0x8   :  { %135 = vst [vmem:[%s345_s1 + $0x60] sm:$0xff] %v49_v12  ;;  %137 = vst [vmem:[%s345_s1 + $0xd0] sm:$0xff] %v136_v13  ;;  %v140_v15 = vld [vmem:[%s344_s0 + $0xd8] sm:$0xff]  ;;  %v144_v17 = vld [vmem:[%s344_s0 + $0xc8] sm:$0xff] }
   0x9   :  { %139 = vst [vmem:[%s345_s1 + $0x8] sm:$0xff] %v138_v14  ;;  %v142_v16 = vld [vmem:[%s344_s0 + $0x58] sm:$0xff]  ;;  %141 = vst [vmem:[%s345_s1 + $0x78] sm:$0xff] %v140_v15  ;;  %v146_v18 = vld [vmem:[%s344_s0 + $0x48] sm:$0xff] }
   0xa   :  { %143 = vst [vmem:[%s345_s1 + $0x18] sm:$0xff] %v142_v16  ;;  %145 = vst [vmem:[%s345_s1 + $0x88] sm:$0xff] %v144_v17  ;;  %v148_v19 = vld [vmem:[%s344_s0 + $0xb8] sm:$0xff]  ;;  %v152_v21 = vld [vmem:[%s344_s0 + $0xa8] sm:$0xff] }
   0xb   :  { %v150_v20 = vld [vmem:[%s344_s0 + $0x38] sm:$0xff]  ;;  %147 = vst [vmem:[%s345_s1 + $0x28] sm:$0xff] %v146_v18  ;;  %149 = vst [vmem:[%s345_s1 + $0x98] sm:$0xff] %v148_v19  ;;  %v154_v22 = vld [vmem:[%s344_s0 + $0x28] sm:$0xff] }
   0xc   :  { %151 = vst [vmem:[%s345_s1 + $0x38] sm:$0xff] %v150_v20  ;;  %v156_v23 = vld [vmem:[%s344_s0 + $0x98] sm:$0xff]  ;;  %153 = vst [vmem:[%s345_s1 + $0xa8] sm:$0xff] %v152_v21  ;;  %v160_v25 = vld [vmem:[%s344_s0 + $0x88] sm:$0xff] }
   0xd   :  { %155 = vst [vmem:[%s345_s1 + $0x48] sm:$0xff] %v154_v22  ;;  %157 = vst [vmem:[%s345_s1 + $0xb8] sm:$0xff] %v156_v23  ;;  %v158_v24 = vld [vmem:[%s344_s0 + $0x18] sm:$0xff]  ;;  %v162_v26 = vld [vmem:[%s344_s0 + $0x8] sm:$0xff] }
   0xe   :  { %159 = vst [vmem:[%s345_s1 + $0x58] sm:$0xff] %v158_v24  ;;  %161 = vst [vmem:[%s345_s1 + $0xc8] sm:$0xff] %v160_v25  ;;  %v164_v27 = vld [vmem:[%s344_s0 + $0x78] sm:$0xff] }
   0xf   :  { %163 = vst [vmem:[%s345_s1 + $0x68] sm:$0xff] %v162_v26  ;;  %165 = vst [vmem:[%s345_s1 + $0xd8] sm:$0xff] %v164_v27 }

// kernel: fno_block2d_amplitude_forward.12
= control target key start
LH: loop header
LB: loop body
LE: loop exit
PB: predicated region body
PF: predicated region fallthrough
CT: control target
= control target key end

     0   :  { %s930_s15 = smov 0   ;;  %s1131_s0 = inlined_call_operand.vmem [shape: bf16[512,32], index: 0, kind: input, shape index: {}]   ;;  %s1132_s1 = inlined_call_operand.vmem [shape: bf16[32,32], index: 1, kind: input, shape index: {}]   ;;  %s1133_s2 = inlined_call_operand.vmem [shape: f32[1,32], index: 2, kind: input, shape index: {}]   ;;  %s1134_s3 = inlined_call_operand.vmem [shape: f32[512,32], index: 3, kind: input, shape index: {}]   ;;  %s1135_s4 = inlined_call_operand.vmem [shape: f32[512,32], index: 4, kind: output, shape index: {}]  }
   0x1 LB: > { %s765_s16 = sadd.s32 4294967295, %s903_s15   ;;  %p769_p0 = scmp.ge.s32.totalorder %s903_s15, 1  ;;  %s903_s15 = sphi %s930_s15, %s14_s15  }
   0x2   : > { %p174_p1 = scmp.lt.s32.totalorder %s903_s15, 3 }
   0x4   : > { %p175_p2 = pnand %p769_p0, %p174_p1 }
   0x5   : > { %s770_s19 = sshll.u32 (!%p175_p2), %s765_s16, 5 }
   0x6   : > { %178 = sbr.rel (%p175_p2) target bundleno = 250 (0xfa), region = 36  ;;  %p206_p3 = scmp.lt.s32.totalorder (!%p175_p2), %s770_s19, 63 }
   0xb   : > { %v879_v0 = vld [vmem:[%s1132_s1 + $0x8] sm:$0xff]   ;;  %v880_v1 = vld [vmem:[%s1132_s1] sm:$0xff]   ;;  %s1137_s19 = smov (!%p206_p3, %s770_s19), 63  ;;  %vm359_vm0 = vcmask 261120  }
   0xc   : > { %831 = vmatprep.subr.bf16.mxu0 %v879_v0  ;;  %867 = vmatprep.subr.bf16.mxu1 %v879_v0  ;;  %s771_s22 = sshll.u32 %s1137_s19, 2  ;;  %s773_s26 = sshll.u32 %s1137_s19, 3  ;;  %v993_v18 = vld [vmem:[%s1133_s2] ss:$0 sm:$0xff] }
   0xd   : > { %832 = vmatpush3.bf16.msra.mxu0 %v879_v0  ;;  %869 = vmatpush3.bf16.msra.mxu1 %v879_v0  ;;  %s950_s25 = scalar_lea.vmem %s1131_s0, %s771_s22  ;;  %s988_s29 = scalar_lea.vmem %s1134_s3, %s773_s26 }
   0xe   : > { %833 = vmatprep.subr.bf16.mxu0 %v880_v1  ;;  %868 = vmatprep.subr.bf16.mxu1 %v880_v1  ;;  %v881_v2 = vld [vmem:[%s950_s25] sm:$0xff]   ;;  %v883_v4 = vld [vmem:[%s950_s25 + $0x8] sm:$0xff]   ;;  %v885_v6 = vld [vmem:[%s950_s25 + $0x10] sm:$0xff]   ;;  %s1005_s8 = scalar_lea.vmem %s1135_s4, %s773_s26 }
   0xf   : > { %v882_v3 = vld [vmem:[%s950_s25 + $0x40] sm:$0xff]   ;;  %835 = vmatprep.mubr.msk.bf16.mxu0 %vm359_vm0, %v881_v2  ;;  %v884_v5 = vld [vmem:[%s950_s25 + $0x48] sm:$0xff]   ;;  %v886_v7 = vld [vmem:[%s950_s25 + $0x50] sm:$0xff]  }
  0x10   : > { %851 = vmatprep.mubr.msk.bf16.mxu1 %vm359_vm0, %v882_v3  ;;  %v887_v8 = vld [vmem:[%s950_s25 + $0x18] sm:$0xff]   ;;  %v889_v10 = vld [vmem:[%s950_s25 + $0x20] sm:$0xff]   ;;  %v891_v12 = vld [vmem:[%s950_s25 + $0x28] sm:$0xff]  }
  0x11   : > { %834 = vmatpush3.bf16.msra.mxu0 %v880_v1  ;;  %870 = vmatpush3.bf16.msra.mxu1 %v880_v1  ;;  %v888_v9 = vld [vmem:[%s950_s25 + $0x58] sm:$0xff]   ;;  %v890_v11 = vld [vmem:[%s950_s25 + $0x60] sm:$0xff]   ;;  %v892_v13 = vld [vmem:[%s950_s25 + $0x68] sm:$0xff]  }
  0x12   : > { %v893_v14 = vld [vmem:[%s950_s25 + $0x30] sm:$0xff]   ;;  %v895_v16 = vld [vmem:[%s950_s25 + $0x38] sm:$0xff]   ;;  %v569_v26 = vld [vmem:[%s988_s29] sm:$0xff] }
  0x13   : > { %v894_v15 = vld [vmem:[%s950_s25 + $0x70] sm:$0xff]   ;;  %v896_v17 = vld [vmem:[%s950_s25 + $0x78] sm:$0xff]   ;;  %v585_v30 = vld [vmem:[%s988_s29 + $0x80] sm:$0xff] }
  0x14   : > { %836 = vmatmul.mubr.msk.bf16.vlgmr.msra.gmra.mxu0 %vm359_vm0, %v883_v4  ;;  %852 = vmatmul.mubr.msk.bf16.vlgmr.msra.gmra.mxu1 %vm359_vm0, %v884_v5  ;;  %v571_v20 = vld [vmem:[%s988_s29 + $0x10] sm:$0xff]  ;;  %v572_v34 = vld [vmem:[%s988_s29 + $0x18] sm:$0xff]  ;;  %v570_v44 = vld [vmem:[%s988_s29 + $0x8] sm:$0xff] }
  0x15   : > { %839 = vmatprep.mubr.msk.bf16.mxu0 %vm359_vm0, %v885_v6  ;;  %855 = vmatprep.mubr.msk.bf16.mxu1 %vm359_vm0, %v886_v7  ;;  %v587_v23 = vld [vmem:[%s988_s29 + $0x90] sm:$0xff]  ;;  %v588_v39 = vld [vmem:[%s988_s29 + $0x98] sm:$0xff]  ;;  %v586_v49 = vld [vmem:[%s988_s29 + $0x88] sm:$0xff] }
  0x16   : > { %v575_v54 = vld [vmem:[%s988_s29 + $0x30] sm:$0xff]  ;;  %v573_v0 = vld [vmem:[%s988_s29 + $0x20] sm:$0xff] }
  0x17   : > { %v591_v59 = vld [vmem:[%s988_s29 + $0xb0] sm:$0xff]  ;;  %v589_v5 = vld [vmem:[%s988_s29 + $0xa0] sm:$0xff] }
  0x1c   : > { %840 = vmatmul.mubr.msk.bf16.gmra.mxu0 %vm359_vm0, %v887_v8  ;;  %856 = vmatmul.mubr.msk.bf16.gmra.mxu1 %vm359_vm0, %v888_v9 }
  0x1d   : > { %843 = vmatprep.mubr.msk.bf16.mxu0 %vm359_vm0, %v889_v10  ;;  %859 = vmatprep.mubr.msk.bf16.mxu1 %vm359_vm0, %v890_v11  ;;  %v576_v10 = vld [vmem:[%s988_s29 + $0x38] sm:$0xff] }
  0x24   : > { %844 = vmatmul.mubr.msk.bf16.gmra.mxu0 %vm359_vm0, %v891_v12  ;;  %860 = vmatmul.mubr.msk.bf16.gmra.mxu1 %vm359_vm0, %v892_v13 }
  0x25   : > { %847 = vmatprep.mubr.msk.bf16.mxu0 %vm359_vm0, %v893_v14  ;;  %863 = vmatprep.mubr.msk.bf16.mxu1 %vm359_vm0, %v894_v15  ;;  %v592_v15 = vld [vmem:[%s988_s29 + $0xb8] sm:$0xff] }
  0x2c   : > { %848 = vmatmul.mubr.msk.bf16.gmra.mxu0 %vm359_vm0, %v895_v16  ;;  %864 = vmatmul.mubr.msk.bf16.gmra.mxu1 %vm359_vm0, %v896_v17 }
  0xd4   : > { %v837_v19 = vpop.f32.mrf.mxu0  ;;  %v853_v22 = vpop.f32.mrf.mxu1 }
  0xd5   : > { %v451_v21 = vadd.f32 %v837_v19, %v993_v18  ;;  %v515_v24 = vadd.f32 %v853_v22, %v993_v18 }
  0xd6   : > { %v442_v25 = vpop.f32.mrf.mxu0  ;;  %v506_v29 = vpop.f32.mrf.mxu1 }
  0xd7   : > { %v603_v27 = vadd.f32 %v571_v20, %v451_v21  ;;  %v443_v28 = vadd.f32 %v993_v18, %v442_v25  ;;  %v619_v31 = vadd.f32 %v587_v23, %v515_v24  ;;  %v507_v32 = vadd.f32 %v993_v18, %v506_v29  ;;  %v574_v21 = vld [vmem:[%s988_s29 + $0x28] sm:$0xff] }
  0xd8   : > { %v838_v33 = vpop.f32.mrf.mxu0  ;;  %v854_v38 = vpop.f32.mrf.mxu1 }
  0xd9   : > { %v635_v35 = vmax.f32 %v603_v27, 0.0  ;;  %v601_v36 = vadd.f32 %v569_v26, %v443_v28  ;;  %v454_v37 = vadd.f32 %v838_v33, %v993_v18  ;;  %v651_v40 = vmax.f32 %v619_v31, 0.0  ;;  %v590_v26 = vld [vmem:[%s988_s29 + $0xa8] sm:$0xff]  ;;  %v579_v31 = vld [vmem:[%s988_s29 + $0x50] sm:$0xff] }
  0xda   : > { %v617_v41 = vadd.f32 %v585_v30, %v507_v32  ;;  %v518_v42 = vadd.f32 %v854_v38, %v993_v18  ;;  %v445_v43 = vpop.f32.mrf.mxu0  ;;  %v509_v48 = vpop.f32.mrf.mxu1 }
  0xdb   : > { %667 = vst.msk [vmem:[%s1005_s8 + $0x10] sm:$0xff] %vm359_vm0, %v635_v35  ;;  %v633_v45 = vmax.f32 %v601_v36, 0.0  ;;  %v604_v46 = vadd.f32 %v572_v34, %v454_v37  ;;  %v446_v47 = vadd.f32 %v993_v18, %v445_v43  ;;  %683 = vst.msk [vmem:[%s1005_s8 + $0x90] sm:$0xff] %vm359_vm0, %v651_v40  ;;  %v510_v52 = vadd.f32 %v993_v18, %v509_v48  ;;  %v595_v36 = vld [vmem:[%s988_s29 + $0xd0] sm:$0xff] }
  0xdc   : > { %v649_v50 = vmax.f32 %v617_v41, 0.0  ;;  %v620_v51 = vadd.f32 %v588_v39, %v518_v42  ;;  %v841_v53 = vpop.f32.mrf.mxu0  ;;  %v857_v58 = vpop.f32.mrf.mxu1  ;;  %v577_v41 = vld [vmem:[%s988_s29 + $0x40] sm:$0xff] }
  0xdd   : > { %665 = vst.msk [vmem:[%s1005_s8] sm:$0xff] %vm359_vm0, %v633_v45  ;;  %v636_v55 = vmax.f32 %v604_v46, 0.0  ;;  %v602_v56 = vadd.f32 %v570_v44, %v446_v47  ;;  %v467_v57 = vadd.f32 %v841_v53, %v993_v18  ;;  %v618_v61 = vadd.f32 %v586_v49, %v510_v52  ;;  %v593_v46 = vld [vmem:[%s988_s29 + $0xc0] sm:$0xff] }
  0xde   : > { %681 = vst.msk [vmem:[%s1005_s8 + $0x80] sm:$0xff] %vm359_vm0, %v649_v50  ;;  %v652_v60 = vmax.f32 %v620_v51, 0.0  ;;  %v531_v62 = vadd.f32 %v857_v58, %v993_v18  ;;  %v458_v63 = vpop.f32.mrf.mxu0  ;;  %v522_v4 = vpop.f32.mrf.mxu1  ;;  %v580_v51 = vld [vmem:[%s988_s29 + $0x58] sm:$0xff] }
  0xdf   : > { %668 = vst.msk [vmem:[%s1005_s8 + $0x18] sm:$0xff] %vm359_vm0, %v636_v55  ;;  %v634_v1 = vmax.f32 %v602_v56, 0.0  ;;  %v607_v2 = vadd.f32 %v575_v54, %v467_v57  ;;  %v459_v3 = vadd.f32 %v993_v18, %v458_v63  ;;  %v650_v6 = vmax.f32 %v618_v61, 0.0  ;;  %v596_v56 = vld [vmem:[%s988_s29 + $0xd8] sm:$0xff]  ;;  %v578_v61 = vld [vmem:[%s988_s29 + $0x48] sm:$0xff] }
  0xe0   : > { %684 = vst.msk [vmem:[%s1005_s8 + $0x98] sm:$0xff] %vm359_vm0, %v652_v60  ;;  %v623_v7 = vadd.f32 %v591_v59, %v531_v62  ;;  %v523_v8 = vadd.f32 %v993_v18, %v522_v4  ;;  %v842_v9 = vpop.f32.mrf.mxu0  ;;  %v858_v14 = vpop.f32.mrf.mxu1 }
  0xe1   : > { %666 = vst.msk [vmem:[%s1005_s8 + $0x8] sm:$0xff] %vm359_vm0, %v634_v1  ;;  %v639_v11 = vmax.f32 %v607_v2, 0.0  ;;  %v605_v12 = vadd.f32 %v573_v0, %v459_v3  ;;  %v470_v13 = vadd.f32 %v842_v9, %v993_v18  ;;  %682 = vst.msk [vmem:[%s1005_s8 + $0x88] sm:$0xff] %vm359_vm0, %v650_v6  ;;  %v534_v19 = vadd.f32 %v858_v14, %v993_v18  ;;  %v594_v2 = vld [vmem:[%s988_s29 + $0xc8] sm:$0xff] }
  0xe2   : > { %v655_v16 = vmax.f32 %v623_v7, 0.0  ;;  %v621_v17 = vadd.f32 %v589_v5, %v523_v8  ;;  %v461_v20 = vpop.f32.mrf.mxu0  ;;  %v525_v25 = vpop.f32.mrf.mxu1  ;;  %v583_v7 = vld [vmem:[%s988_s29 + $0x70] sm:$0xff] }
  0xe3   : > { %671 = vst.msk [vmem:[%s1005_s8 + $0x30] sm:$0xff] %vm359_vm0, %v639_v11  ;;  %v637_v22 = vmax.f32 %v605_v12, 0.0  ;;  %v608_v23 = vadd.f32 %v576_v10, %v470_v13  ;;  %v462_v24 = vadd.f32 %v993_v18, %v461_v20  ;;  %v624_v28 = vadd.f32 %v592_v15, %v534_v19  ;;  %v599_v12 = vld [vmem:[%s988_s29 + $0xf0] sm:$0xff] }
  0xe4   : > { %687 = vst.msk [vmem:[%s1005_s8 + $0xb0] sm:$0xff] %vm359_vm0, %v655_v16  ;;  %v653_v27 = vmax.f32 %v621_v17, 0.0  ;;  %v526_v29 = vadd.f32 %v993_v18, %v525_v25  ;;  %v845_v30 = vpop.f32.mrf.mxu0  ;;  %v861_v35 = vpop.f32.mrf.mxu1  ;;  %v581_v17 = vld [vmem:[%s988_s29 + $0x60] sm:$0xff] }
  0xe5   : > { %669 = vst.msk [vmem:[%s1005_s8 + $0x20] sm:$0xff] %vm359_vm0, %v637_v22  ;;  %v640_v32 = vmax.f32 %v608_v23, 0.0  ;;  %v606_v33 = vadd.f32 %v574_v21, %v462_v24  ;;  %v483_v34 = vadd.f32 %v845_v30, %v993_v18  ;;  %v656_v37 = vmax.f32 %v624_v28, 0.0  ;;  %v597_v23 = vld [vmem:[%s988_s29 + $0xe0] sm:$0xff]  ;;  %v584_v28 = vld [vmem:[%s988_s29 + $0x78] sm:$0xff] }
  0xe6   : > { %685 = vst.msk [vmem:[%s1005_s8 + $0xa0] sm:$0xff] %vm359_vm0, %v653_v27  ;;  %v622_v38 = vadd.f32 %v590_v26, %v526_v29  ;;  %v547_v39 = vadd.f32 %v861_v35, %v993_v18  ;;  %v474_v40 = vpop.f32.mrf.mxu0  ;;  %v538_v45 = vpop.f32.mrf.mxu1 }
  0xe7   : > { %672 = vst.msk [vmem:[%s1005_s8 + $0x38] sm:$0xff] %vm359_vm0, %v640_v32  ;;  %v638_v42 = vmax.f32 %v606_v33, 0.0  ;;  %v611_v43 = vadd.f32 %v579_v31, %v483_v34  ;;  %v475_v44 = vadd.f32 %v993_v18, %v474_v40  ;;  %688 = vst.msk [vmem:[%s1005_s8 + $0xb8] sm:$0xff] %vm359_vm0, %v656_v37  ;;  %v539_v49 = vadd.f32 %v993_v18, %v538_v45  ;;  %v600_v33 = vld [vmem:[%s988_s29 + $0xf8] sm:$0xff] }
  0xe8   : > { %v654_v47 = vmax.f32 %v622_v38, 0.0  ;;  %v627_v48 = vadd.f32 %v595_v36, %v547_v39  ;;  %v846_v50 = vpop.f32.mrf.mxu0  ;;  %v862_v55 = vpop.f32.mrf.mxu1  ;;  %v582_v38 = vld [vmem:[%s988_s29 + $0x68] sm:$0xff] }
  0xe9   : > { %670 = vst.msk [vmem:[%s1005_s8 + $0x28] sm:$0xff] %vm359_vm0, %v638_v42  ;;  %v643_v52 = vmax.f32 %v611_v43, 0.0  ;;  %v609_v53 = vadd.f32 %v577_v41, %v475_v44  ;;  %v486_v54 = vadd.f32 %v846_v50, %v993_v18  ;;  %v625_v58 = vadd.f32 %v593_v46, %v539_v49  ;;  %v598_v43 = vld [vmem:[%s988_s29 + $0xe8] sm:$0xff] }
  0xea   : > { %686 = vst.msk [vmem:[%s1005_s8 + $0xa8] sm:$0xff] %vm359_vm0, %v654_v47  ;;  %v659_v57 = vmax.f32 %v627_v48, 0.0  ;;  %v550_v59 = vadd.f32 %v862_v55, %v993_v18  ;;  %v477_v60 = vpop.f32.mrf.mxu0  ;;  %v541_v1 = vpop.f32.mrf.mxu1 }
  0xeb   : > { %675 = vst.msk [vmem:[%s1005_s8 + $0x50] sm:$0xff] %vm359_vm0, %v643_v52  ;;  %v641_v62 = vmax.f32 %v609_v53, 0.0  ;;  %v612_v63 = vadd.f32 %v580_v51, %v486_v54  ;;  %v478_v0 = vadd.f32 %v993_v18, %v477_v60  ;;  %v657_v3 = vmax.f32 %v625_v58, 0.0 }
  0xec   : > { %691 = vst.msk [vmem:[%s1005_s8 + $0xd0] sm:$0xff] %vm359_vm0, %v659_v57  ;;  %v628_v4 = vadd.f32 %v596_v56, %v550_v59  ;;  %v542_v5 = vadd.f32 %v993_v18, %v541_v1  ;;  %v849_v6 = vpop.f32.mrf.mxu0  ;;  %v865_v11 = vpop.f32.mrf.mxu1 }
  0xed   : > { %673 = vst.msk [vmem:[%s1005_s8 + $0x40] sm:$0xff] %vm359_vm0, %v641_v62  ;;  %v644_v8 = vmax.f32 %v612_v63, 0.0  ;;  %v610_v9 = vadd.f32 %v578_v61, %v478_v0  ;;  %v499_v10 = vadd.f32 %v849_v6, %v993_v18  ;;  %689 = vst.msk [vmem:[%s1005_s8 + $0xc0] sm:$0xff] %vm359_vm0, %v657_v3  ;;  %v563_v15 = vadd.f32 %v865_v11, %v993_v18 }
  0xee   : > { %v660_v13 = vmax.f32 %v628_v4, 0.0  ;;  %v626_v14 = vadd.f32 %v594_v2, %v542_v5  ;;  %v490_v16 = vpop.f32.mrf.mxu0  ;;  %v554_v22 = vpop.f32.mrf.mxu1 }
  0xef   : > { %676 = vst.msk [vmem:[%s1005_s8 + $0x58] sm:$0xff] %vm359_vm0, %v644_v8  ;;  %v642_v19 = vmax.f32 %v610_v9, 0.0  ;;  %v615_v20 = vadd.f32 %v583_v7, %v499_v10  ;;  %v491_v21 = vadd.f32 %v993_v18, %v490_v16  ;;  %v631_v25 = vadd.f32 %v599_v12, %v563_v15 }
  0xf0   : > { %692 = vst.msk [vmem:[%s1005_s8 + $0xd8] sm:$0xff] %vm359_vm0, %v660_v13  ;;  %v658_v24 = vmax.f32 %v626_v14, 0.0  ;;  %v555_v26 = vadd.f32 %v993_v18, %v554_v22  ;;  %v850_v27 = vpop.f32.mrf.mxu0  ;;  %v866_v32 = vpop.f32.mrf.mxu1 }
  0xf1   : > { %674 = vst.msk [vmem:[%s1005_s8 + $0x48] sm:$0xff] %vm359_vm0, %v642_v19  ;;  %v647_v29 = vmax.f32 %v615_v20, 0.0  ;;  %v613_v30 = vadd.f32 %v581_v17, %v491_v21  ;;  %v502_v31 = vadd.f32 %v850_v27, %v993_v18  ;;  %v663_v34 = vmax.f32 %v631_v25, 0.0 }
  0xf2   : > { %690 = vst.msk [vmem:[%s1005_s8 + $0xc8] sm:$0xff] %vm359_vm0, %v658_v24  ;;  %v629_v35 = vadd.f32 %v597_v23, %v555_v26  ;;  %v566_v36 = vadd.f32 %v866_v32, %v993_v18  ;;  %v493_v37 = vpop.f32.mrf.mxu0  ;;  %v557_v42 = vpop.f32.mrf.mxu1 }
  0xf3   : > { %679 = vst.msk [vmem:[%s1005_s8 + $0x70] sm:$0xff] %vm359_vm0, %v647_v29  ;;  %v645_v39 = vmax.f32 %v613_v30, 0.0  ;;  %v616_v40 = vadd.f32 %v584_v28, %v502_v31  ;;  %v494_v41 = vadd.f32 %v993_v18, %v493_v37  ;;  %695 = vst.msk [vmem:[%s1005_s8 + $0xf0] sm:$0xff] %vm359_vm0, %v663_v34  ;;  %v558_v46 = vadd.f32 %v993_v18, %v557_v42 }
  0xf4   : > { %v661_v44 = vmax.f32 %v629_v35, 0.0  ;;  %v632_v45 = vadd.f32 %v600_v33, %v566_v36 }
  0xf5   : > { %677 = vst.msk [vmem:[%s1005_s8 + $0x60] sm:$0xff] %vm359_vm0, %v645_v39  ;;  %v648_v47 = vmax.f32 %v616_v40, 0.0  ;;  %v614_v48 = vadd.f32 %v582_v38, %v494_v41  ;;  %v630_v50 = vadd.f32 %v598_v43, %v558_v46 }
  0xf6   : > { %693 = vst.msk [vmem:[%s1005_s8 + $0xe0] sm:$0xff] %vm359_vm0, %v661_v44  ;;  %v664_v49 = vmax.f32 %v632_v45, 0.0 }
  0xf7   : > { %680 = vst.msk [vmem:[%s1005_s8 + $0x78] sm:$0xff] %vm359_vm0, %v648_v47  ;;  %v646_v51 = vmax.f32 %v614_v48, 0.0  ;;  %v662_v52 = vmax.f32 %v630_v50, 0.0 }
  0xf8   : > { %696 = vst.msk [vmem:[%s1005_s8 + $0xf8] sm:$0xff] %vm359_vm0, %v664_v49 }
  0xf9   : > { %678 = vst.msk [vmem:[%s1005_s8 + $0x68] sm:$0xff] %vm359_vm0, %v646_v51  ;;  %694 = vst.msk [vmem:[%s1005_s8 + $0xe8] sm:$0xff] %vm359_vm0, %v662_v52 }
  0xfa PF: > { %s14_s15 = sadd.s32 1, %s903_s15  }
  0xfb   : > { %p11_p4 = scmp.ge.s32.totalorder %s14_s15, 4  }
  0xfd   :  { %13 = sbr.rel (!%p11_p4) target bundleno = 1 (0x1), region = 69 }

// kernel: fno_block2d_amplitude_forward.18
= control target key start
LH: loop header
LB: loop body
LE: loop exit
PB: predicated region body
PF: predicated region fallthrough
CT: control target
= control target key end

     0   :  { %s898_s15 = smov 0   ;;  %s1099_s0 = inlined_call_operand.vmem [shape: bf16[512,32], index: 0, kind: input, shape index: {}]   ;;  %s1100_s1 = inlined_call_operand.vmem [shape: bf16[32,32], index: 1, kind: input, shape index: {}]   ;;  %s1101_s2 = inlined_call_operand.vmem [shape: f32[1,32], index: 2, kind: input, shape index: {}]   ;;  %s1102_s3 = inlined_call_operand.vmem [shape: f32[512,32], index: 3, kind: input, shape index: {}]   ;;  %s1103_s4 = inlined_call_operand.vmem [shape: f32[512,32], index: 4, kind: output, shape index: {}]  }
   0x1 LB: > { %s733_s16 = sadd.s32 4294967295, %s871_s15   ;;  %p737_p0 = scmp.ge.s32.totalorder %s871_s15, 1  ;;  %s871_s15 = sphi %s898_s15, %s14_s15  }
   0x2   : > { %p174_p1 = scmp.lt.s32.totalorder %s871_s15, 3 }
   0x4   : > { %p175_p2 = pnand %p737_p0, %p174_p1 }
   0x5   : > { %s738_s19 = sshll.u32 (!%p175_p2), %s733_s16, 5 }
   0x6   : > { %178 = sbr.rel (%p175_p2) target bundleno = 248 (0xf8), region = 36  ;;  %p206_p3 = scmp.lt.s32.totalorder (!%p175_p2), %s738_s19, 63 }
   0xb   : > { %v847_v0 = vld [vmem:[%s1100_s1 + $0x8] sm:$0xff]   ;;  %v848_v1 = vld [vmem:[%s1100_s1] sm:$0xff]   ;;  %s1105_s19 = smov (!%p206_p3, %s738_s19), 63  ;;  %vm359_vm0 = vcmask 261120  }
   0xc   : > { %799 = vmatprep.subr.bf16.mxu0 %v847_v0  ;;  %835 = vmatprep.subr.bf16.mxu1 %v847_v0  ;;  %s739_s22 = sshll.u32 %s1105_s19, 2  ;;  %s741_s26 = sshll.u32 %s1105_s19, 3  ;;  %v961_v18 = vld [vmem:[%s1101_s2] ss:$0 sm:$0xff] }
   0xd   : > { %800 = vmatpush3.bf16.msra.mxu0 %v847_v0  ;;  %837 = vmatpush3.bf16.msra.mxu1 %v847_v0  ;;  %s918_s25 = scalar_lea.vmem %s1099_s0, %s739_s22  ;;  %s956_s29 = scalar_lea.vmem %s1102_s3, %s741_s26 }
   0xe   : > { %801 = vmatprep.subr.bf16.mxu0 %v848_v1  ;;  %836 = vmatprep.subr.bf16.mxu1 %v848_v1  ;;  %v849_v2 = vld [vmem:[%s918_s25] sm:$0xff]   ;;  %v851_v4 = vld [vmem:[%s918_s25 + $0x8] sm:$0xff]   ;;  %v853_v6 = vld [vmem:[%s918_s25 + $0x10] sm:$0xff]   ;;  %s969_s8 = scalar_lea.vmem %s1103_s4, %s741_s26 }
   0xf   : > { %v850_v3 = vld [vmem:[%s918_s25 + $0x40] sm:$0xff]   ;;  %803 = vmatprep.mubr.msk.bf16.mxu0 %vm359_vm0, %v849_v2  ;;  %v852_v5 = vld [vmem:[%s918_s25 + $0x48] sm:$0xff]   ;;  %v854_v7 = vld [vmem:[%s918_s25 + $0x50] sm:$0xff]  }
  0x10   : > { %819 = vmatprep.mubr.msk.bf16.mxu1 %vm359_vm0, %v850_v3  ;;  %v855_v8 = vld [vmem:[%s918_s25 + $0x18] sm:$0xff]   ;;  %v857_v10 = vld [vmem:[%s918_s25 + $0x20] sm:$0xff]   ;;  %v859_v12 = vld [vmem:[%s918_s25 + $0x28] sm:$0xff]  }
  0x11   : > { %802 = vmatpush3.bf16.msra.mxu0 %v848_v1  ;;  %838 = vmatpush3.bf16.msra.mxu1 %v848_v1  ;;  %v856_v9 = vld [vmem:[%s918_s25 + $0x58] sm:$0xff]   ;;  %v858_v11 = vld [vmem:[%s918_s25 + $0x60] sm:$0xff]   ;;  %v860_v13 = vld [vmem:[%s918_s25 + $0x68] sm:$0xff]  }
  0x12   : > { %v861_v14 = vld [vmem:[%s918_s25 + $0x30] sm:$0xff]   ;;  %v863_v16 = vld [vmem:[%s918_s25 + $0x38] sm:$0xff]   ;;  %v569_v26 = vld [vmem:[%s956_s29] sm:$0xff] }
  0x13   : > { %v862_v15 = vld [vmem:[%s918_s25 + $0x70] sm:$0xff]   ;;  %v864_v17 = vld [vmem:[%s918_s25 + $0x78] sm:$0xff]   ;;  %v585_v30 = vld [vmem:[%s956_s29 + $0x80] sm:$0xff] }
  0x14   : > { %804 = vmatmul.mubr.msk.bf16.vlgmr.msra.gmra.mxu0 %vm359_vm0, %v851_v4  ;;  %820 = vmatmul.mubr.msk.bf16.vlgmr.msra.gmra.mxu1 %vm359_vm0, %v852_v5  ;;  %v571_v20 = vld [vmem:[%s956_s29 + $0x10] sm:$0xff]  ;;  %v572_v34 = vld [vmem:[%s956_s29 + $0x18] sm:$0xff]  ;;  %v570_v42 = vld [vmem:[%s956_s29 + $0x8] sm:$0xff] }
  0x15   : > { %807 = vmatprep.mubr.msk.bf16.mxu0 %vm359_vm0, %v853_v6  ;;  %823 = vmatprep.mubr.msk.bf16.mxu1 %vm359_vm0, %v854_v7  ;;  %v587_v23 = vld [vmem:[%s956_s29 + $0x90] sm:$0xff]  ;;  %v588_v38 = vld [vmem:[%s956_s29 + $0x98] sm:$0xff]  ;;  %v586_v46 = vld [vmem:[%s956_s29 + $0x88] sm:$0xff] }
  0x16   : > { %v575_v50 = vld [vmem:[%s956_s29 + $0x30] sm:$0xff]  ;;  %v573_v58 = vld [vmem:[%s956_s29 + $0x20] sm:$0xff]  ;;  %v576_v2 = vld [vmem:[%s956_s29 + $0x38] sm:$0xff] }
  0x17   : > { %v591_v54 = vld [vmem:[%s956_s29 + $0xb0] sm:$0xff]  ;;  %v589_v62 = vld [vmem:[%s956_s29 + $0xa0] sm:$0xff]  ;;  %v592_v6 = vld [vmem:[%s956_s29 + $0xb8] sm:$0xff] }
  0x1c   : > { %808 = vmatmul.mubr.msk.bf16.gmra.mxu0 %vm359_vm0, %v855_v8  ;;  %824 = vmatmul.mubr.msk.bf16.gmra.mxu1 %vm359_vm0, %v856_v9 }
  0x1d   : > { %811 = vmatprep.mubr.msk.bf16.mxu0 %vm359_vm0, %v857_v10  ;;  %827 = vmatprep.mubr.msk.bf16.mxu1 %vm359_vm0, %v858_v11  ;;  %v574_v10 = vld [vmem:[%s956_s29 + $0x28] sm:$0xff] }
  0x24   : > { %812 = vmatmul.mubr.msk.bf16.gmra.mxu0 %vm359_vm0, %v859_v12  ;;  %828 = vmatmul.mubr.msk.bf16.gmra.mxu1 %vm359_vm0, %v860_v13 }
  0x25   : > { %815 = vmatprep.mubr.msk.bf16.mxu0 %vm359_vm0, %v861_v14  ;;  %831 = vmatprep.mubr.msk.bf16.mxu1 %vm359_vm0, %v862_v15  ;;  %v590_v14 = vld [vmem:[%s956_s29 + $0xa8] sm:$0xff] }
  0x2c   : > { %816 = vmatmul.mubr.msk.bf16.gmra.mxu0 %vm359_vm0, %v863_v16  ;;  %832 = vmatmul.mubr.msk.bf16.gmra.mxu1 %vm359_vm0, %v864_v17 }
  0xd4   : > { %v805_v19 = vpop.f32.mrf.mxu0  ;;  %v821_v22 = vpop.f32.mrf.mxu1 }
  0xd5   : > { %v451_v21 = vadd.f32 %v805_v19, %v961_v18  ;;  %v515_v24 = vadd.f32 %v821_v22, %v961_v18  ;;  %v579_v19 = vld [vmem:[%s956_s29 + $0x50] sm:$0xff] }
  0xd6   : > { %v442_v25 = vpop.f32.mrf.mxu0  ;;  %v506_v29 = vpop.f32.mrf.mxu1 }
  0xd7   : > { %v603_v27 = vadd.f32 %v571_v20, %v451_v21  ;;  %v443_v28 = vadd.f32 %v961_v18, %v442_v25  ;;  %v619_v31 = vadd.f32 %v587_v23, %v515_v24  ;;  %v507_v32 = vadd.f32 %v961_v18, %v506_v29  ;;  %v595_v23 = vld [vmem:[%s956_s29 + $0xd0] sm:$0xff] }
  0xd8   : > { %v806_v33 = vpop.f32.mrf.mxu0  ;;  %v822_v37 = vpop.f32.mrf.mxu1 }
  0xd9   : > { %635 = vst.msk [vmem:[%s969_s8 + $0x10] sm:$0xff] %vm359_vm0, %v603_v27  ;;  %v601_v35 = vadd.f32 %v569_v26, %v443_v28  ;;  %v454_v36 = vadd.f32 %v806_v33, %v961_v18  ;;  %651 = vst.msk [vmem:[%s969_s8 + $0x90] sm:$0xff] %vm359_vm0, %v619_v31  ;;  %v617_v39 = vadd.f32 %v585_v30, %v507_v32  ;;  %v577_v27 = vld [vmem:[%s956_s29 + $0x40] sm:$0xff] }
  0xda   : > { %v518_v40 = vadd.f32 %v822_v37, %v961_v18  ;;  %v445_v41 = vpop.f32.mrf.mxu0  ;;  %v509_v45 = vpop.f32.mrf.mxu1  ;;  %v593_v31 = vld [vmem:[%s956_s29 + $0xc0] sm:$0xff] }
  0xdb   : > { %633 = vst.msk [vmem:[%s969_s8] sm:$0xff] %vm359_vm0, %v601_v35  ;;  %v604_v43 = vadd.f32 %v572_v34, %v454_v36  ;;  %v446_v44 = vadd.f32 %v961_v18, %v445_v41  ;;  %649 = vst.msk [vmem:[%s969_s8 + $0x80] sm:$0xff] %vm359_vm0, %v617_v39  ;;  %v510_v48 = vadd.f32 %v961_v18, %v509_v45  ;;  %v580_v35 = vld [vmem:[%s956_s29 + $0x58] sm:$0xff] }
  0xdc   : > { %v620_v47 = vadd.f32 %v588_v38, %v518_v40  ;;  %v809_v49 = vpop.f32.mrf.mxu0  ;;  %v825_v53 = vpop.f32.mrf.mxu1  ;;  %v596_v39 = vld [vmem:[%s956_s29 + $0xd8] sm:$0xff] }
  0xdd   : > { %636 = vst.msk [vmem:[%s969_s8 + $0x18] sm:$0xff] %vm359_vm0, %v604_v43  ;;  %v602_v51 = vadd.f32 %v570_v42, %v446_v44  ;;  %v467_v52 = vadd.f32 %v809_v49, %v961_v18  ;;  %v618_v55 = vadd.f32 %v586_v46, %v510_v48  ;;  %v531_v56 = vadd.f32 %v825_v53, %v961_v18  ;;  %v578_v43 = vld [vmem:[%s956_s29 + $0x48] sm:$0xff] }
  0xde   : > { %652 = vst.msk [vmem:[%s969_s8 + $0x98] sm:$0xff] %vm359_vm0, %v620_v47  ;;  %v458_v57 = vpop.f32.mrf.mxu0  ;;  %v522_v61 = vpop.f32.mrf.mxu1  ;;  %v594_v47 = vld [vmem:[%s956_s29 + $0xc8] sm:$0xff] }
  0xdf   : > { %634 = vst.msk [vmem:[%s969_s8 + $0x8] sm:$0xff] %vm359_vm0, %v602_v51  ;;  %v607_v59 = vadd.f32 %v575_v50, %v467_v52  ;;  %v459_v60 = vadd.f32 %v961_v18, %v458_v57  ;;  %650 = vst.msk [vmem:[%s969_s8 + $0x88] sm:$0xff] %vm359_vm0, %v618_v55  ;;  %v623_v63 = vadd.f32 %v591_v54, %v531_v56  ;;  %v583_v51 = vld [vmem:[%s956_s29 + $0x70] sm:$0xff] }
  0xe0   : > { %v523_v0 = vadd.f32 %v961_v18, %v522_v61  ;;  %v810_v1 = vpop.f32.mrf.mxu0  ;;  %v826_v5 = vpop.f32.mrf.mxu1  ;;  %v599_v55 = vld [vmem:[%s956_s29 + $0xf0] sm:$0xff] }
  0xe1   : > { %639 = vst.msk [vmem:[%s969_s8 + $0x30] sm:$0xff] %vm359_vm0, %v607_v59  ;;  %v605_v3 = vadd.f32 %v573_v58, %v459_v60  ;;  %v470_v4 = vadd.f32 %v810_v1, %v961_v18  ;;  %655 = vst.msk [vmem:[%s969_s8 + $0xb0] sm:$0xff] %vm359_vm0, %v623_v63  ;;  %v534_v8 = vadd.f32 %v826_v5, %v961_v18  ;;  %v581_v59 = vld [vmem:[%s956_s29 + $0x60] sm:$0xff] }
  0xe2   : > { %v621_v7 = vadd.f32 %v589_v62, %v523_v0  ;;  %v461_v9 = vpop.f32.mrf.mxu0  ;;  %v525_v13 = vpop.f32.mrf.mxu1  ;;  %v597_v63 = vld [vmem:[%s956_s29 + $0xe0] sm:$0xff] }
  0xe3   : > { %637 = vst.msk [vmem:[%s969_s8 + $0x20] sm:$0xff] %vm359_vm0, %v605_v3  ;;  %v608_v11 = vadd.f32 %v576_v2, %v470_v4  ;;  %v462_v12 = vadd.f32 %v961_v18, %v461_v9  ;;  %v624_v15 = vadd.f32 %v592_v6, %v534_v8  ;;  %v526_v16 = vadd.f32 %v961_v18, %v525_v13  ;;  %v584_v3 = vld [vmem:[%s956_s29 + $0x78] sm:$0xff] }
  0xe4   : > { %653 = vst.msk [vmem:[%s969_s8 + $0xa0] sm:$0xff] %vm359_vm0, %v621_v7  ;;  %v813_v17 = vpop.f32.mrf.mxu0  ;;  %v829_v22 = vpop.f32.mrf.mxu1  ;;  %v600_v7 = vld [vmem:[%s956_s29 + $0xf8] sm:$0xff] }
  0xe5   : > { %640 = vst.msk [vmem:[%s969_s8 + $0x38] sm:$0xff] %vm359_vm0, %v608_v11  ;;  %v606_v20 = vadd.f32 %v574_v10, %v462_v12  ;;  %v483_v21 = vadd.f32 %v813_v17, %v961_v18  ;;  %656 = vst.msk [vmem:[%s969_s8 + $0xb8] sm:$0xff] %vm359_vm0, %v624_v15  ;;  %v622_v24 = vadd.f32 %v590_v14, %v526_v16  ;;  %v582_v11 = vld [vmem:[%s956_s29 + $0x68] sm:$0xff] }
  0xe6   : > { %v547_v25 = vadd.f32 %v829_v22, %v961_v18  ;;  %v474_v26 = vpop.f32.mrf.mxu0  ;;  %v538_v30 = vpop.f32.mrf.mxu1  ;;  %v598_v15 = vld [vmem:[%s956_s29 + $0xe8] sm:$0xff] }
  0xe7   : > { %638 = vst.msk [vmem:[%s969_s8 + $0x28] sm:$0xff] %vm359_vm0, %v606_v20  ;;  %v611_v28 = vadd.f32 %v579_v19, %v483_v21  ;;  %v475_v29 = vadd.f32 %v961_v18, %v474_v26  ;;  %654 = vst.msk [vmem:[%s969_s8 + $0xa8] sm:$0xff] %vm359_vm0, %v622_v24  ;;  %v539_v33 = vadd.f32 %v961_v18, %v538_v30 }
  0xe8   : > { %v627_v32 = vadd.f32 %v595_v23, %v547_v25  ;;  %v814_v34 = vpop.f32.mrf.mxu0  ;;  %v830_v38 = vpop.f32.mrf.mxu1 }
  0xe9   : > { %643 = vst.msk [vmem:[%s969_s8 + $0x50] sm:$0xff] %vm359_vm0, %v611_v28  ;;  %v609_v36 = vadd.f32 %v577_v27, %v475_v29  ;;  %v486_v37 = vadd.f32 %v814_v34, %v961_v18  ;;  %v625_v40 = vadd.f32 %v593_v31, %v539_v33  ;;  %v550_v41 = vadd.f32 %v830_v38, %v961_v18 }
  0xea   : > { %659 = vst.msk [vmem:[%s969_s8 + $0xd0] sm:$0xff] %vm359_vm0, %v627_v32  ;;  %v477_v42 = vpop.f32.mrf.mxu0  ;;  %v541_v46 = vpop.f32.mrf.mxu1 }
  0xeb   : > { %641 = vst.msk [vmem:[%s969_s8 + $0x40] sm:$0xff] %vm359_vm0, %v609_v36  ;;  %v612_v44 = vadd.f32 %v580_v35, %v486_v37  ;;  %v478_v45 = vadd.f32 %v961_v18, %v477_v42  ;;  %657 = vst.msk [vmem:[%s969_s8 + $0xc0] sm:$0xff] %vm359_vm0, %v625_v40  ;;  %v628_v48 = vadd.f32 %v596_v39, %v550_v41 }
  0xec   : > { %v542_v49 = vadd.f32 %v961_v18, %v541_v46  ;;  %v817_v50 = vpop.f32.mrf.mxu0  ;;  %v833_v54 = vpop.f32.mrf.mxu1 }
  0xed   : > { %644 = vst.msk [vmem:[%s969_s8 + $0x58] sm:$0xff] %vm359_vm0, %v612_v44  ;;  %v610_v52 = vadd.f32 %v578_v43, %v478_v45  ;;  %v499_v53 = vadd.f32 %v817_v50, %v961_v18  ;;  %660 = vst.msk [vmem:[%s969_s8 + $0xd8] sm:$0xff] %vm359_vm0, %v628_v48  ;;  %v563_v57 = vadd.f32 %v833_v54, %v961_v18 }
  0xee   : > { %v626_v56 = vadd.f32 %v594_v47, %v542_v49  ;;  %v490_v58 = vpop.f32.mrf.mxu0  ;;  %v554_v62 = vpop.f32.mrf.mxu1 }
  0xef   : > { %642 = vst.msk [vmem:[%s969_s8 + $0x48] sm:$0xff] %vm359_vm0, %v610_v52  ;;  %v615_v60 = vadd.f32 %v583_v51, %v499_v53  ;;  %v491_v61 = vadd.f32 %v961_v18, %v490_v58  ;;  %v631_v0 = vadd.f32 %v599_v55, %v563_v57  ;;  %v555_v1 = vadd.f32 %v961_v18, %v554_v62 }
  0xf0   : > { %658 = vst.msk [vmem:[%s969_s8 + $0xc8] sm:$0xff] %vm359_vm0, %v626_v56  ;;  %v818_v2 = vpop.f32.mrf.mxu0  ;;  %v834_v6 = vpop.f32.mrf.mxu1 }
  0xf1   : > { %647 = vst.msk [vmem:[%s969_s8 + $0x70] sm:$0xff] %vm359_vm0, %v615_v60  ;;  %v613_v4 = vadd.f32 %v581_v59, %v491_v61  ;;  %v502_v5 = vadd.f32 %v818_v2, %v961_v18  ;;  %663 = vst.msk [vmem:[%s969_s8 + $0xf0] sm:$0xff] %vm359_vm0, %v631_v0  ;;  %v629_v8 = vadd.f32 %v597_v63, %v555_v1 }
  0xf2   : > { %v566_v9 = vadd.f32 %v834_v6, %v961_v18  ;;  %v493_v10 = vpop.f32.mrf.mxu0  ;;  %v557_v14 = vpop.f32.mrf.mxu1 }
  0xf3   : > { %645 = vst.msk [vmem:[%s969_s8 + $0x60] sm:$0xff] %vm359_vm0, %v613_v4  ;;  %v616_v12 = vadd.f32 %v584_v3, %v502_v5  ;;  %v494_v13 = vadd.f32 %v961_v18, %v493_v10  ;;  %661 = vst.msk [vmem:[%s969_s8 + $0xe0] sm:$0xff] %vm359_vm0, %v629_v8  ;;  %v558_v17 = vadd.f32 %v961_v18, %v557_v14 }
  0xf4   : > { %v632_v16 = vadd.f32 %v600_v7, %v566_v9 }
  0xf5   : > { %648 = vst.msk [vmem:[%s969_s8 + $0x78] sm:$0xff] %vm359_vm0, %v616_v12  ;;  %v614_v19 = vadd.f32 %v582_v11, %v494_v13  ;;  %v630_v20 = vadd.f32 %v598_v15, %v558_v17 }
  0xf6   : > { %664 = vst.msk [vmem:[%s969_s8 + $0xf8] sm:$0xff] %vm359_vm0, %v632_v16 }
  0xf7   : > { %646 = vst.msk [vmem:[%s969_s8 + $0x68] sm:$0xff] %vm359_vm0, %v614_v19  ;;  %662 = vst.msk [vmem:[%s969_s8 + $0xe8] sm:$0xff] %vm359_vm0, %v630_v20 }
  0xf8 PF: > { %s14_s15 = sadd.s32 1, %s871_s15  }
  0xf9   : > { %p11_p4 = scmp.ge.s32.totalorder %s14_s15, 4  }
  0xfb   :  { %13 = sbr.rel (!%p11_p4) target bundleno = 1 (0x1), region = 69 }

// kernel: fno_block2d_amplitude_forward.19
= control target key start
LH: loop header
LB: loop body
LE: loop exit
PB: predicated region body
PF: predicated region fallthrough
CT: control target
= control target key end

     0   :  { %s1211_s18 = smov 0   ;;  %s1404_s0 = inlined_call_operand.vmem [shape: bf16[512,32], index: 0, kind: input, shape index: {}]   ;;  %s1405_s1 = inlined_call_operand.vmem [shape: bf16[32,128], index: 1, kind: input, shape index: {}]   ;;  %s1406_s2 = inlined_call_operand.vmem [shape: f32[1,128], index: 2, kind: input, shape index: {}]   ;;  %s1407_s3 = inlined_call_operand.vmem [shape: bf16[128,128], index: 3, kind: input, shape index: {}]   ;;  %s1408_s4 = inlined_call_operand.vmem [shape: f32[1,128], index: 4, kind: input, shape index: {}]   ;;  %s1409_s5 = inlined_call_operand.vmem [shape: f32[512,128], index: 5, kind: output, shape index: {}]  }
   0x1 LB: > { %s942_s19 = sadd.s32 4294967295, %s1179_s18   ;;  %p946_p0 = scmp.ge.s32.totalorder %s1179_s18, 1  ;;  %s1179_s18 = sphi %s1211_s18, %s15_s18  }
   0x2   : > { %p188_p1 = scmp.lt.s32.totalorder %s1179_s18, 3 }
   0x4   : > { %p189_p2 = pnand %p946_p0, %p188_p1 }
   0x5   : > { %s947_s22 = sshll.u32 (!%p189_p2), %s942_s19, 5 }
   0x6   : > { %192 = sbr.rel (%p189_p2) target bundleno = 484 (0x1e4), region = 40  ;;  %p217_p3 = scmp.lt.s32.totalorder (!%p189_p2), %s947_s22, 63 }
   0xb   : > { %v1147_v0 = vld [vmem:[%s1405_s1 + $0x8] sm:$0xff]   ;;  %v1148_v1 = vld [vmem:[%s1405_s1] sm:$0xff]   ;;  %v1165_v2 = vld [vmem:[%s1407_s3 + $0x38] sm:$0xff]   ;;  %s1411_s22 = smov (!%p217_p3, %s947_s22), 63  ;;  %vm364_vm0 = vcmask 261120  }
   0xc   : > { %1039 = vmatprep.subr.bf16.mxu0 %v1147_v0  ;;  %v1166_v3 = vld [vmem:[%s1407_s3 + $0x30] sm:$0xff]   ;;  %1123 = vmatprep.subr.bf16.mxu1 %v1165_v2  ;;  %s948_s29 = sshll.u32 %s1411_s22, 2  ;;  %v1167_v4 = vld [vmem:[%s1407_s3 + $0x28] sm:$0xff]   ;;  %v1168_v8 = vld [vmem:[%s1407_s3 + $0x20] sm:$0xff]   ;;  %s950_s24 = sshll.u32 %s1411_s22, 3 }
   0xd   : > { %1040 = vmatpush3.bf16.msra.mxu0 %v1147_v0  ;;  %1131 = vmatpush3.bf16.msra.mxu1 %v1165_v2  ;;  %s1237_s7 = scalar_lea.vmem %s1404_s0, %s948_s29  ;;  %v1169_v11 = vld [vmem:[%s1407_s3 + $0x18] sm:$0xff]   ;;  %v1170_v23 = vld [vmem:[%s1407_s3 + $0x10] sm:$0xff]   ;;  %v1171_v24 = vld [vmem:[%s1407_s3 + $0x8] sm:$0xff]   ;;  %s1335_s29 = scalar_lea.vmem %s1409_s5, %s950_s24 }
   0xe   : > { %1041 = vmatprep.subr.bf16.mxu0 %v1148_v1  ;;  %1124 = vmatprep.subr.bf16.mxu1 %v1166_v3  ;;  %v1149_v5 = vld [vmem:[%s1237_s7] sm:$0xff]   ;;  %v1150_v6 = vld [vmem:[%s1237_s7 + $0x8] sm:$0xff]   ;;  %v1151_v7 = vld [vmem:[%s1237_s7 + $0x10] sm:$0xff]  }
   0xf   : > { %1043 = vmatprep.mubr.msk.bf16.mxu0 %vm364_vm0, %v1149_v5  ;;  %v1152_v9 = vld [vmem:[%s1237_s7 + $0x18] sm:$0xff]   ;;  %v1153_v10 = vld [vmem:[%s1237_s7 + $0x20] sm:$0xff]   ;;  %v1154_v12 = vld [vmem:[%s1237_s7 + $0x28] sm:$0xff]  }
  0x10   : > { %v1155_v13 = vld [vmem:[%s1237_s7 + $0x30] sm:$0xff]   ;;  %v1156_v14 = vld [vmem:[%s1237_s7 + $0x38] sm:$0xff]   ;;  %v1157_v15 = vld [vmem:[%s1237_s7 + $0x40] sm:$0xff]  }
  0x11   : > { %1042 = vmatpush3.bf16.msra.mxu0 %v1148_v1  ;;  %1132 = vmatpush3.bf16.msra.mxu1 %v1166_v3  ;;  %v1158_v16 = vld [vmem:[%s1237_s7 + $0x48] sm:$0xff]   ;;  %v1159_v17 = vld [vmem:[%s1237_s7 + $0x50] sm:$0xff]   ;;  %v1160_v18 = vld [vmem:[%s1237_s7 + $0x58] sm:$0xff]  }
  0x12   : > { %1075 = vmatprep.subr.bf16.mxu0 %v1165_v2  ;;  %1125 = vmatprep.subr.bf16.mxu1 %v1167_v4  ;;  %v1161_v19 = vld [vmem:[%s1237_s7 + $0x60] sm:$0xff]   ;;  %v1162_v20 = vld [vmem:[%s1237_s7 + $0x68] sm:$0xff]   ;;  %v1163_v21 = vld [vmem:[%s1237_s7 + $0x70] sm:$0xff]  }
  0x13   : > { %v1164_v22 = vld [vmem:[%s1237_s7 + $0x78] sm:$0xff]   ;;  %v1172_v25 = vld [vmem:[%s1407_s3] sm:$0xff]  }
  0x14   : > { %1044 = vmatmul.mubr.msk.bf16.vlgmr.msra.gmra.mxu0 %vm364_vm0, %v1150_v6  ;;  %v1292_v28 = vld [vmem:[%s1406_s2] ss:$0 sm:$0xff] }
  0x15   : > { %1047 = vmatprep.mubr.msk.bf16.mxu0 %vm364_vm0, %v1151_v7  ;;  %1076 = vmatpush3.bf16.msra.mxu0 %v1165_v2 }
  0x16   : > { %1077 = vmatprep.subr.bf16.mxu0 %v1166_v3  ;;  %1133 = vmatpush3.bf16.msra.mxu1 %v1167_v4 }
  0x17   : > { %1126 = vmatprep.subr.bf16.mxu1 %v1168_v8 }
  0x19   : > { %1078 = vmatpush3.bf16.msra.mxu0 %v1166_v3 }
  0x1a   : > { %1079 = vmatprep.subr.bf16.mxu0 %v1167_v4  ;;  %1134 = vmatpush3.bf16.msra.mxu1 %v1168_v8 }
  0x1b   : > { %1127 = vmatprep.subr.bf16.mxu1 %v1169_v11 }
  0x1c   : > { %1048 = vmatmul.mubr.msk.bf16.gmra.mxu0 %vm364_vm0, %v1152_v9 }
  0x1d   : > { %1051 = vmatprep.mubr.msk.bf16.mxu0 %vm364_vm0, %v1153_v10  ;;  %1080 = vmatpush3.bf16.msra.mxu0 %v1167_v4 }
  0x1e   : > { %1081 = vmatprep.subr.bf16.mxu0 %v1168_v8  ;;  %1135 = vmatpush3.bf16.msra.mxu1 %v1169_v11 }
  0x1f   : > { %1128 = vmatprep.subr.bf16.mxu1 %v1170_v23 }
  0x21   : > { %1082 = vmatpush3.bf16.msra.mxu0 %v1168_v8 }
  0x22   : > { %1083 = vmatprep.subr.bf16.mxu0 %v1169_v11  ;;  %1136 = vmatpush3.bf16.msra.mxu1 %v1170_v23 }
  0x23   : > { %1129 = vmatprep.subr.bf16.mxu1 %v1171_v24 }
  0x24   : > { %1052 = vmatmul.mubr.msk.bf16.gmra.mxu0 %vm364_vm0, %v1154_v12 }
  0x25   : > { %1055 = vmatprep.mubr.msk.bf16.mxu0 %vm364_vm0, %v1155_v13  ;;  %1084 = vmatpush3.bf16.msra.mxu0 %v1169_v11 }
  0x26   : > { %1085 = vmatprep.subr.bf16.mxu0 %v1170_v23  ;;  %1137 = vmatpush3.bf16.msra.mxu1 %v1171_v24 }
  0x27   : > { %1130 = vmatprep.subr.bf16.mxu1 %v1172_v25 }
  0x29   : > { %1086 = vmatpush3.bf16.msra.mxu0 %v1170_v23 }
  0x2a   : > { %1087 = vmatprep.subr.bf16.mxu0 %v1171_v24  ;;  %1138 = vmatpush3.bf16.msra.mxu1 %v1172_v25 }
  0x2c   : > { %1056 = vmatmul.mubr.msk.bf16.gmra.mxu0 %vm364_vm0, %v1156_v14 }
  0x2d   : > { %1059 = vmatprep.mubr.msk.bf16.mxu0 %vm364_vm0, %v1157_v15  ;;  %1088 = vmatpush3.bf16.msra.mxu0 %v1171_v24 }
  0x2e   : > { %1089 = vmatprep.subr.bf16.mxu0 %v1172_v25 }
  0x31   : > { %1090 = vmatpush3.bf16.msra.mxu0 %v1172_v25 }
  0x34   : > { %1060 = vmatmul.mubr.msk.bf16.gmra.mxu0 %vm364_vm0, %v1158_v16 }
  0x35   : > { %1063 = vmatprep.mubr.msk.bf16.mxu0 %vm364_vm0, %v1159_v17 }
  0x3c   : > { %1064 = vmatmul.mubr.msk.bf16.gmra.mxu0 %vm364_vm0, %v1160_v18 }
  0x3d   : > { %1067 = vmatprep.mubr.msk.bf16.mxu0 %vm364_vm0, %v1161_v19 }
  0x44   : > { %1068 = vmatmul.mubr.msk.bf16.gmra.mxu0 %vm364_vm0, %v1162_v20 }
  0x45   : > { %1071 = vmatprep.mubr.msk.bf16.mxu0 %vm364_vm0, %v1163_v21 }
  0x4c   : > { %1072 = vmatmul.mubr.msk.bf16.gmra.mxu0 %vm364_vm0, %v1164_v22 }
  0xd4   : > { %v1045_v26 = vpop.f32.mrf.mxu0 }
  0xd5   : > { %v456_v32 = vadd.f32 %v1045_v26, %v1292_v28 }
  0xd6   : > { %v447_v27 = vpop.f32.mrf.mxu0 }
  0xd7   : > { %v448_v30 = vadd.f32 %v1292_v28, %v447_v27  ;;  %v576_v39 = vmax.f32 %v456_v32, 0.0 }
  0xd8   : > { %v1046_v29 = vpop.f32.mrf.mxu0 }
  0xd9   : > { %v459_v31 = vadd.f32 %v1046_v29, %v1292_v28  ;;  %v574_v37 = vmax.f32 %v448_v30, 0.0 }
  0xda   : > { %v450_v33 = vpop.f32.mrf.mxu0 }
  0xdb   : > { %v451_v34 = vadd.f32 %v1292_v28, %v450_v33  ;;  %v577_v35 = vmax.f32 %v459_v31, 0.0 }
  0xdc   : > { %v1049_v36 = vpop.f32.mrf.mxu0 }
  0xdd   : > { %v575_v38 = vmax.f32 %v451_v34, 0.0  ;;  %v607_v42 = vpack.c.bf16 %v577_v35, %v576_v39  ;;  %v472_v46 = vadd.f32 %v1049_v36, %v1292_v28 }
  0xde   : > { %v463_v40 = vpop.f32.mrf.mxu0 }
  0xdf   : > { %v606_v41 = vpack.c.bf16 %v575_v38, %v574_v37  ;;  %v464_v44 = vadd.f32 %v1292_v28, %v463_v40  ;;  %v580_v53 = vmax.f32 %v472_v46, 0.0 }
  0xe0   : > { %v1050_v43 = vpop.f32.mrf.mxu0 }
  0xe1   : > { %v475_v45 = vadd.f32 %v1050_v43, %v1292_v28  ;;  %1091 = vmatprep.mubr.bf16.mxu0 %v606_v41  ;;  %v578_v51 = vmax.f32 %v464_v44, 0.0 }
  0xe2   : > { %v466_v47 = vpop.f32.mrf.mxu0  ;;  %1092 = vmatmul.mubr.bf16.vlgmr.msra.gmra.mxu0 %v607_v42 }
  0xe3   : > { %v467_v48 = vadd.f32 %v1292_v28, %v466_v47  ;;  %v581_v49 = vmax.f32 %v475_v45, 0.0 }
  0xe4   : > { %v1053_v50 = vpop.f32.mrf.mxu0 }
  0xe5   : > { %v579_v52 = vmax.f32 %v467_v48, 0.0  ;;  %v609_v56 = vpack.c.bf16 %v581_v49, %v580_v53  ;;  %v488_v60 = vadd.f32 %v1053_v50, %v1292_v28 }
  0xe6   : > { %v479_v54 = vpop.f32.mrf.mxu0 }
  0xe7   : > { %v608_v55 = vpack.c.bf16 %v579_v52, %v578_v51  ;;  %v480_v58 = vadd.f32 %v1292_v28, %v479_v54  ;;  %v584_v3 = vmax.f32 %v488_v60, 0.0 }
  0xe8   : > { %v1054_v57 = vpop.f32.mrf.mxu0 }
  0xe9   : > { %v491_v59 = vadd.f32 %v1054_v57, %v1292_v28  ;;  %1095 = vmatprep.mubr.bf16.mxu1 %v608_v55  ;;  %v582_v1 = vmax.f32 %v480_v58, 0.0 }
  0xea   : > { %v482_v61 = vpop.f32.mrf.mxu0  ;;  %1096 = vmatmul.mubr.bf16.vlgmr.msra.gmra.mxu1 %v609_v56 }
  0xeb   : > { %v483_v62 = vadd.f32 %v1292_v28, %v482_v61  ;;  %v585_v63 = vmax.f32 %v491_v59, 0.0 }
  0xec   : > { %v1057_v0 = vpop.f32.mrf.mxu0 }
  0xed   : > { %v583_v2 = vmax.f32 %v483_v62, 0.0  ;;  %v611_v6 = vpack.c.bf16 %v585_v63, %v584_v3  ;;  %v504_v10 = vadd.f32 %v1057_v0, %v1292_v28 }
  0xee   : > { %v495_v4 = vpop.f32.mrf.mxu0 }
  0xef   : > { %v610_v5 = vpack.c.bf16 %v583_v2, %v582_v1  ;;  %v496_v8 = vadd.f32 %v1292_v28, %v495_v4  ;;  %v588_v17 = vmax.f32 %v504_v10, 0.0 }
  0xf0   : > { %v1058_v7 = vpop.f32.mrf.mxu0 }
  0xf1   : > { %v507_v9 = vadd.f32 %v1058_v7, %v1292_v28  ;;  %1099 = vmatprep.mubr.bf16.mxu1 %v610_v5  ;;  %v586_v15 = vmax.f32 %v496_v8, 0.0 }
  0xf2   : > { %v498_v11 = vpop.f32.mrf.mxu0  ;;  %1100 = vmatmul.mubr.bf16.gmra.mxu1 %v611_v6 }
  0xf3   : > { %v499_v12 = vadd.f32 %v1292_v28, %v498_v11  ;;  %v589_v13 = vmax.f32 %v507_v9, 0.0 }
  0xf4   : > { %v1061_v14 = vpop.f32.mrf.mxu0 }
  0xf5   : > { %v587_v16 = vmax.f32 %v499_v12, 0.0  ;;  %v613_v20 = vpack.c.bf16 %v589_v13, %v588_v17  ;;  %v520_v24 = vadd.f32 %v1061_v14, %v1292_v28  ;;  %v1330_v12 = vld [vmem:[%s1408_s4] ss:$0 sm:$0xff] }
  0xf6   : > { %v511_v18 = vpop.f32.mrf.mxu0 }
  0xf7   : > { %v612_v19 = vpack.c.bf16 %v587_v16, %v586_v15  ;;  %v512_v22 = vadd.f32 %v1292_v28, %v511_v18  ;;  %v592_v32 = vmax.f32 %v520_v24, 0.0 }
  0xf8   : > { %v1062_v21 = vpop.f32.mrf.mxu0 }
  0xf9   : > { %v523_v23 = vadd.f32 %v1062_v21, %v1292_v28  ;;  %1103 = vmatprep.mubr.bf16.mxu1 %v612_v19  ;;  %v590_v30 = vmax.f32 %v512_v22, 0.0 }
  0xfa   : > { %v514_v25 = vpop.f32.mrf.mxu0  ;;  %1104 = vmatmul.mubr.bf16.gmra.mxu1 %v613_v20 }
  0xfb   : > { %v515_v26 = vadd.f32 %v1292_v28, %v514_v25  ;;  %v593_v27 = vmax.f32 %v523_v23, 0.0 }
  0xfc   : > { %v1065_v29 = vpop.f32.mrf.mxu0 }
  0xfd   : > { %v591_v31 = vmax.f32 %v515_v26, 0.0  ;;  %v615_v35 = vpack.c.bf16 %v593_v27, %v592_v32  ;;  %v536_v39 = vadd.f32 %v1065_v29, %v1292_v28 }
  0xfe   : > { %v527_v33 = vpop.f32.mrf.mxu0 }
  0xff   : > { %v614_v34 = vpack.c.bf16 %v591_v31, %v590_v30  ;;  %v528_v37 = vadd.f32 %v1292_v28, %v527_v33  ;;  %v596_v46 = vmax.f32 %v536_v39, 0.0 }
 0x100   : > { %v1066_v36 = vpop.f32.mrf.mxu0 }
 0x101   : > { %v539_v38 = vadd.f32 %v1066_v36, %v1292_v28  ;;  %1107 = vmatprep.mubr.bf16.mxu1 %v614_v34  ;;  %v594_v44 = vmax.f32 %v528_v37, 0.0 }
 0x102   : > { %v530_v40 = vpop.f32.mrf.mxu0  ;;  %1108 = vmatmul.mubr.bf16.gmra.mxu1 %v615_v35 }
 0x103   : > { %v531_v41 = vadd.f32 %v1292_v28, %v530_v40  ;;  %v597_v42 = vmax.f32 %v539_v38, 0.0 }
 0x104   : > { %v1069_v43 = vpop.f32.mrf.mxu0 }
 0x105   : > { %v595_v45 = vmax.f32 %v531_v41, 0.0  ;;  %v617_v49 = vpack.c.bf16 %v597_v42, %v596_v46  ;;  %v552_v53 = vadd.f32 %v1069_v43, %v1292_v28 }
 0x106   : > { %v543_v47 = vpop.f32.mrf.mxu0 }
 0x107   : > { %v616_v48 = vpack.c.bf16 %v595_v45, %v594_v44  ;;  %v544_v51 = vadd.f32 %v1292_v28, %v543_v47  ;;  %v600_v60 = vmax.f32 %v552_v53, 0.0 }
 0x108   : > { %v1070_v50 = vpop.f32.mrf.mxu0 }
 0x109   : > { %v555_v52 = vadd.f32 %v1070_v50, %v1292_v28  ;;  %1111 = vmatprep.mubr.bf16.mxu1 %v616_v48  ;;  %v598_v58 = vmax.f32 %v544_v51, 0.0 }
 0x10a   : > { %v546_v54 = vpop.f32.mrf.mxu0  ;;  %1112 = vmatmul.mubr.bf16.gmra.mxu1 %v617_v49 }
 0x10b   : > { %v547_v55 = vadd.f32 %v1292_v28, %v546_v54  ;;  %v601_v56 = vmax.f32 %v555_v52, 0.0 }
 0x10c   : > { %v1073_v57 = vpop.f32.mrf.mxu0 }
 0x10d   : > { %v599_v59 = vmax.f32 %v547_v55, 0.0  ;;  %v619_v63 = vpack.c.bf16 %v601_v56, %v600_v60  ;;  %v568_v3 = vadd.f32 %v1073_v57, %v1292_v28 }
 0x10e   : > { %v559_v61 = vpop.f32.mrf.mxu0 }
 0x10f   : > { %v618_v62 = vpack.c.bf16 %v599_v59, %v598_v58  ;;  %v560_v1 = vadd.f32 %v1292_v28, %v559_v61  ;;  %v604_v9 = vmax.f32 %v568_v3, 0.0 }
 0x110   : > { %v1074_v0 = vpop.f32.mrf.mxu0 }
 0x111   : > { %v571_v2 = vadd.f32 %v1074_v0, %v1292_v28  ;;  %1115 = vmatprep.mubr.bf16.mxu1 %v618_v62  ;;  %v602_v7 = vmax.f32 %v560_v1, 0.0 }
 0x112   : > { %v562_v4 = vpop.f32.mrf.mxu0  ;;  %1116 = vmatmul.mubr.bf16.gmra.mxu1 %v619_v63 }
 0x113   : > { %v563_v5 = vadd.f32 %v1292_v28, %v562_v4  ;;  %v605_v6 = vmax.f32 %v571_v2, 0.0 }
 0x115   : > { %v603_v8 = vmax.f32 %v563_v5, 0.0  ;;  %v621_v11 = vpack.c.bf16 %v605_v6, %v604_v9 }
 0x117   : > { %v620_v10 = vpack.c.bf16 %v603_v8, %v602_v7 }
 0x119   : > { %1119 = vmatprep.mubr.bf16.mxu1 %v620_v10 }
 0x11a   : > { %1120 = vmatmul.mubr.bf16.gmra.mxu1 %v621_v11 }
 0x1a2   : > { %v1093_v28 = vpop.f32.mrf.mxu0 }
 0x1a3   : > { %v736_v13 = vadd.f32 %v1093_v28, %v1330_v12 }
 0x1a4   : > { %v727_v14 = vpop.f32.mrf.mxu0 }
 0x1a5   : > { %856 = vst [vmem:[%s1335_s29 + $0x10] sm:$0xff] %v736_v13  ;;  %v728_v15 = vadd.f32 %v1330_v12, %v727_v14 }
 0x1a6   : > { %v1094_v16 = vpop.f32.mrf.mxu0 }
 0x1a7   : > { %854 = vst [vmem:[%s1335_s29] sm:$0xff] %v728_v15  ;;  %v739_v17 = vadd.f32 %v1094_v16, %v1330_v12 }
 0x1a8   : > { %v730_v18 = vpop.f32.mrf.mxu0 }
 0x1a9   : > { %857 = vst [vmem:[%s1335_s29 + $0x18] sm:$0xff] %v739_v17  ;;  %v731_v19 = vadd.f32 %v1330_v12, %v730_v18 }
 0x1aa   : > { %v1097_v20 = vpop.f32.mrf.mxu1 }
 0x1ab   : > { %855 = vst [vmem:[%s1335_s29 + $0x8] sm:$0xff] %v731_v19  ;;  %v752_v21 = vadd.f32 %v1097_v20, %v1330_v12 }
 0x1ac   : > { %v743_v22 = vpop.f32.mrf.mxu1 }
 0x1ad   : > { %860 = vst [vmem:[%s1335_s29 + $0x30] sm:$0xff] %v752_v21  ;;  %v744_v23 = vadd.f32 %v1330_v12, %v743_v22 }
 0x1ae   : > { %v1098_v24 = vpop.f32.mrf.mxu1 }
 0x1af   : > { %858 = vst [vmem:[%s1335_s29 + $0x20] sm:$0xff] %v744_v23  ;;  %v755_v25 = vadd.f32 %v1098_v24, %v1330_v12 }
 0x1b0   : > { %v746_v26 = vpop.f32.mrf.mxu1 }
 0x1b1   : > { %861 = vst [vmem:[%s1335_s29 + $0x38] sm:$0xff] %v755_v25  ;;  %v747_v27 = vadd.f32 %v1330_v12, %v746_v26 }
 0x1b2   : > { %v1101_v29 = vpop.f32.mrf.mxu1 }
 0x1b3   : > { %859 = vst [vmem:[%s1335_s29 + $0x28] sm:$0xff] %v747_v27  ;;  %v768_v30 = vadd.f32 %v1101_v29, %v1330_v12 }
 0x1b4   : > { %v759_v31 = vpop.f32.mrf.mxu1 }
 0x1b5   : > { %864 = vst [vmem:[%s1335_s29 + $0x50] sm:$0xff] %v768_v30  ;;  %v760_v32 = vadd.f32 %v1330_v12, %v759_v31 }
 0x1b6   : > { %v1102_v33 = vpop.f32.mrf.mxu1 }
 0x1b7   : > { %862 = vst [vmem:[%s1335_s29 + $0x40] sm:$0xff] %v760_v32  ;;  %v771_v34 = vadd.f32 %v1102_v33, %v1330_v12 }
 0x1b8   : > { %v762_v35 = vpop.f32.mrf.mxu1 }
 0x1b9   : > { %865 = vst [vmem:[%s1335_s29 + $0x58] sm:$0xff] %v771_v34  ;;  %v763_v36 = vadd.f32 %v1330_v12, %v762_v35 }
 0x1ba   : > { %v1105_v37 = vpop.f32.mrf.mxu1 }
 0x1bb   : > { %863 = vst [vmem:[%s1335_s29 + $0x48] sm:$0xff] %v763_v36  ;;  %v784_v38 = vadd.f32 %v1105_v37, %v1330_v12 }
 0x1bc   : > { %v775_v39 = vpop.f32.mrf.mxu1 }
 0x1bd   : > { %868 = vst [vmem:[%s1335_s29 + $0x70] sm:$0xff] %v784_v38  ;;  %v776_v40 = vadd.f32 %v1330_v12, %v775_v39 }
 0x1be   : > { %v1106_v41 = vpop.f32.mrf.mxu1 }
 0x1bf   : > { %866 = vst [vmem:[%s1335_s29 + $0x60] sm:$0xff] %v776_v40  ;;  %v787_v42 = vadd.f32 %v1106_v41, %v1330_v12 }
 0x1c0   : > { %v778_v43 = vpop.f32.mrf.mxu1 }
 0x1c1   : > { %869 = vst [vmem:[%s1335_s29 + $0x78] sm:$0xff] %v787_v42  ;;  %v779_v44 = vadd.f32 %v1330_v12, %v778_v43 }
 0x1c2   : > { %v1109_v45 = vpop.f32.mrf.mxu1 }
 0x1c3   : > { %867 = vst [vmem:[%s1335_s29 + $0x68] sm:$0xff] %v779_v44  ;;  %v800_v46 = vadd.f32 %v1109_v45, %v1330_v12 }
 0x1c4   : > { %v791_v47 = vpop.f32.mrf.mxu1 }
 0x1c5   : > { %872 = vst [vmem:[%s1335_s29 + $0x90] sm:$0xff] %v800_v46  ;;  %v792_v48 = vadd.f32 %v1330_v12, %v791_v47 }
 0x1c6   : > { %v1110_v49 = vpop.f32.mrf.mxu1 }
 0x1c7   : > { %870 = vst [vmem:[%s1335_s29 + $0x80] sm:$0xff] %v792_v48  ;;  %v803_v50 = vadd.f32 %v1110_v49, %v1330_v12 }
 0x1c8   : > { %v794_v51 = vpop.f32.mrf.mxu1 }
 0x1c9   : > { %873 = vst [vmem:[%s1335_s29 + $0x98] sm:$0xff] %v803_v50  ;;  %v795_v52 = vadd.f32 %v1330_v12, %v794_v51 }
 0x1ca   : > { %v1113_v53 = vpop.f32.mrf.mxu1 }
 0x1cb   : > { %871 = vst [vmem:[%s1335_s29 + $0x88] sm:$0xff] %v795_v52  ;;  %v816_v54 = vadd.f32 %v1113_v53, %v1330_v12 }
 0x1cc   : > { %v807_v55 = vpop.f32.mrf.mxu1 }
 0x1cd   : > { %876 = vst [vmem:[%s1335_s29 + $0xb0] sm:$0xff] %v816_v54  ;;  %v808_v56 = vadd.f32 %v1330_v12, %v807_v55 }
 0x1ce   : > { %v1114_v57 = vpop.f32.mrf.mxu1 }
 0x1cf   : > { %874 = vst [vmem:[%s1335_s29 + $0xa0] sm:$0xff] %v808_v56  ;;  %v819_v58 = vadd.f32 %v1114_v57, %v1330_v12 }
 0x1d0   : > { %v810_v59 = vpop.f32.mrf.mxu1 }
 0x1d1   : > { %877 = vst [vmem:[%s1335_s29 + $0xb8] sm:$0xff] %v819_v58  ;;  %v811_v60 = vadd.f32 %v1330_v12, %v810_v59 }
 0x1d2   : > { %v1117_v61 = vpop.f32.mrf.mxu1 }
 0x1d3   : > { %875 = vst [vmem:[%s1335_s29 + $0xa8] sm:$0xff] %v811_v60  ;;  %v832_v62 = vadd.f32 %v1117_v61, %v1330_v12 }
 0x1d4   : > { %v823_v63 = vpop.f32.mrf.mxu1 }
 0x1d5   : > { %880 = vst [vmem:[%s1335_s29 + $0xd0] sm:$0xff] %v832_v62  ;;  %v824_v0 = vadd.f32 %v1330_v12, %v823_v63 }
 0x1d6   : > { %v1118_v1 = vpop.f32.mrf.mxu1 }
 0x1d7   : > { %878 = vst [vmem:[%s1335_s29 + $0xc0] sm:$0xff] %v824_v0  ;;  %v835_v2 = vadd.f32 %v1118_v1, %v1330_v12 }
 0x1d8   : > { %v826_v3 = vpop.f32.mrf.mxu1 }
 0x1d9   : > { %881 = vst [vmem:[%s1335_s29 + $0xd8] sm:$0xff] %v835_v2  ;;  %v827_v4 = vadd.f32 %v1330_v12, %v826_v3 }
 0x1da   : > { %v1121_v5 = vpop.f32.mrf.mxu1 }
 0x1db   : > { %879 = vst [vmem:[%s1335_s29 + $0xc8] sm:$0xff] %v827_v4  ;;  %v848_v6 = vadd.f32 %v1121_v5, %v1330_v12 }
 0x1dc   : > { %v839_v7 = vpop.f32.mrf.mxu1 }
 0x1dd   : > { %884 = vst [vmem:[%s1335_s29 + $0xf0] sm:$0xff] %v848_v6  ;;  %v840_v8 = vadd.f32 %v1330_v12, %v839_v7 }
 0x1de   : > { %v1122_v9 = vpop.f32.mrf.mxu1 }
 0x1df   : > { %882 = vst [vmem:[%s1335_s29 + $0xe0] sm:$0xff] %v840_v8  ;;  %v851_v10 = vadd.f32 %v1122_v9, %v1330_v12 }
 0x1e0   : > { %v842_v11 = vpop.f32.mrf.mxu1 }
 0x1e1   : > { %885 = vst [vmem:[%s1335_s29 + $0xf8] sm:$0xff] %v851_v10  ;;  %v843_v28 = vadd.f32 %v1330_v12, %v842_v11 }
 0x1e3   : > { %883 = vst [vmem:[%s1335_s29 + $0xe8] sm:$0xff] %v843_v28 }
 0x1e4 PF: > { %s15_s18 = sadd.s32 1, %s1179_s18  }
 0x1e5   : > { %p12_p4 = scmp.ge.s32.totalorder %s15_s18, 4  }
 0x1e7   :  { %14 = sbr.rel (!%p12_p4) target bundleno = 1 (0x1), region = 70 }

</bundles_post_ra>
